<compile_context>
chip_gen: v7x
topology: tpu7x:2x2x1
jax: 0.10.0
libtpu: 0.0.40
codegen_flags: <defaults>
</compile_context>

<pallas_src>
import jax
import jax.numpy as jnp
from jax import lax
from jax.experimental import pallas as pl
from jax.experimental.pallas import tpu as pltpu

N_OUT = 256          # n_out in the PyTorch module
POOL = 3             # pooling_size (kernel == stride, padding = 1)
EPS = 1e-5           # BatchNorm1d default eps
_MAX_TILE = 2048     # output-length tile cap (2 MiB f32 output block)


def _initial_block_kernel(x_ref, w_ref, o_ref):
    # x_ref: (1, POOL, C_aug, TILE)  pooling-phase-split, padded input (+ ones channel)
    # w_ref: (N_OUT, C_aug)          BN-scale-folded conv weight; BN shift in the ones column
    # o_ref: (1, N_OUT, TILE)
    w = w_ref[...]
    acc = jnp.dot(w, x_ref[0, 0, :, :],
                  preferred_element_type=jnp.float32,
                  precision=lax.Precision.HIGHEST)
    for k in range(1, POOL):                     # remaining taps of MaxPool(kernel=3, stride=3)
        z = jnp.dot(w, x_ref[0, k, :, :],
                    preferred_element_type=jnp.float32,
                    precision=lax.Precision.HIGHEST)
        acc = jnp.maximum(acc, z)
    # ReLU after the max: identical result (pad columns are exactly 0), fewer VPU ops.
    o_ref[0, :, :] = jnp.maximum(acc, 0.0).astype(o_ref.dtype)   # one dense store per step


def _pick_tile(l_out):
    """Output-length tile: full extent when small, else 2048 (lane-dense, VMEM-sized)."""
    return l_out if l_out <= _MAX_TILE else _MAX_TILE


def initial_block(x_ncl, w, b, gamma, beta, out_dtype=jnp.float32):
    """x_ncl: (N, C_in, L); w: (256, C_in) (= conv1.weight[:, :, 0]); b: (256,) conv bias;
    gamma/beta: (256,) BN affine.  Returns (N, 256, L_out) in `out_dtype`
    (training-mode BatchNorm batch statistics)."""
    # conv bias cancels exactly under training-mode BatchNorm mean-subtraction.
    del b
    n, c_in, l = x_ncl.shape
    x = x_ncl.astype(jnp.float32)
    w = w.astype(jnp.float32)
    gamma = gamma.astype(jnp.float32)
    beta = beta.astype(jnp.float32)

    l_out = (l + 2 - POOL) // POOL + 1          # PyTorch MaxPool1d output length

    # --- training-mode BN batch stats, analytically from x (tiny C_in x C_in problem) ---
    mean_x = jnp.mean(x, axis=(0, 2))                                       # (C_in,)
    xc = x - mean_x[None, :, None]
    cov_x = jnp.einsum('nct,ndt->cd', xc, xc,
                       precision=lax.Precision.HIGHEST) / (n * l)           # biased, centred, f32
    mean_y = jnp.einsum('dc,c->d', w, mean_x, precision=lax.Precision.HIGHEST)
    var_y = jnp.einsum('dc,ce,de->d', w, cov_x, w,
                       precision=lax.Precision.HIGHEST)                     # (256,)
    scale = gamma * lax.rsqrt(var_y + EPS)
    shift = beta - mean_y * scale

    # --- fold BN into the conv: y_bn = (scale*W) @ x + shift (shift via ones channel) ---
    c_aug = ((c_in + 1 + 7) // 8) * 8           # +1 ones channel, rounded up to sublane mult.
    w_aug = jnp.zeros((N_OUT, c_aug), jnp.float32)
    w_aug = w_aug.at[:, :c_in].set(w * scale[:, None])
    w_aug = w_aug.at[:, c_in].set(shift)

    # --- pad + phase-split the (tiny) input; pool window j reads padded cols 3j..3j+2 ---
    tile = _pick_tile(l_out)
    num_tiles = pl.cdiv(l_out, tile)
    l_out_p = num_tiles * tile                  # only the INPUT is padded; output stays l_out
    covered = min(l, POOL * l_out - 1)          # original columns visible to some window
    parts = [x[:, :, :covered], jnp.ones((n, 1, covered), jnp.float32)]
    if c_aug - c_in - 1 > 0:
        parts.append(jnp.zeros((n, c_aug - c_in - 1, covered), jnp.float32))
    xa = jnp.concatenate(parts, axis=1)                                     # (n, c_aug, covered)
    xa = jnp.pad(xa, ((0, 0), (0, 0), (1, POOL * l_out_p - 1 - covered)))   # zeros: pad cols -> 0
    xph = xa.reshape(n, c_aug, l_out_p, POOL).transpose(0, 3, 1, 2)         # (n, 3, c_aug, l_out_p)

    # --- VMEM budget: double-buffered in/out + weight + headroom for f32 kernel temps ---
    out_bytes = jnp.dtype(out_dtype).itemsize
    blk_in = POOL * c_aug * tile * 4
    blk_out = N_OUT * tile * out_bytes
    blk_out_f32 = N_OUT * tile * 4
    w_bytes = N_OUT * c_aug * 4
    vmem_limit = int(min(max(2 * blk_in + 2 * blk_out + 2 * w_bytes
                             + 6 * blk_out_f32 + (1 << 20),
                             8 * 1024 * 1024),
                         40 * 1024 * 1024))
    cost = pl.CostEstimate(
        flops=2 * n * POOL * l_out_p * N_OUT * c_aug + 3 * n * l_out_p * N_OUT,
        transcendentals=0,
        bytes_accessed=int(xph.size * 4 + w_bytes + n * N_OUT * l_out * out_bytes))

    # Grid = (L_out tiles, batch): tile axis first so v7x megacore shards the big axis.
    out = pl.pallas_call(
        _initial_block_kernel,
        out_shape=jax.ShapeDtypeStruct((n, N_OUT, l_out), out_dtype),
        grid=(num_tiles, n),
        in_specs=[
            pl.BlockSpec((1, POOL, c_aug, tile), lambda t, i: (i, 0, 0, t)),
            pl.BlockSpec((N_OUT, c_aug), lambda t, i: (0, 0)),
        ],
        out_specs=pl.BlockSpec((1, N_OUT, tile), lambda t, i: (i, 0, t)),
        compiler_params=pltpu.CompilerParams(
            dimension_semantics=("parallel", "parallel"),
            vmem_limit_bytes=vmem_limit),
        cost_estimate=cost,
    )(xph, w_aug)

    return out


def initial_block_ref(x, w, b, gamma, beta):
    """Pure-JAX reference mirroring the PyTorch training-mode forward (bias included)."""
    y = jnp.einsum('nct,dc->ndt', x.astype(jnp.float32), w.astype(jnp.float32),
                   precision=lax.Precision.HIGHEST)
    y = y + b.astype(jnp.float32)[None, :, None]
    mean = jnp.mean(y, axis=(0, 2), keepdims=True)
    var = jnp.mean((y - mean) ** 2, axis=(0, 2), keepdims=True)      # biased variance
    y = (y - mean) * (gamma[None, :, None] * lax.rsqrt(var + EPS)) + beta[None, :, None]
    y = jnp.maximum(y, 0.0)
    pooled = lax.reduce_window(
        y, -jnp.inf, lax.max,
        window_dimensions=(1, 1, POOL),
        window_strides=(1, 1, POOL),
        padding=((0, 0), (0, 0), (1, 1)))
    return pooled


if __name__ == "__main__":
    key = jax.random.PRNGKey(0)
    k_x, k_w, k_b, k_g, k_be = jax.random.split(key, 5)

    # Conv1d input: (batch, in_channels, length); PyTorch param shapes squeezed of k=1.
    N, C_IN, L = 2, 4, 96
    x = jax.random.normal(k_x, (N, C_IN, L), dtype=jnp.float32)
    w = 0.1 * jax.random.normal(k_w, (N_OUT, C_IN), dtype=jnp.float32)    # conv1.weight[:, :, 0]
    b = 0.05 * jax.random.normal(k_b, (N_OUT,), dtype=jnp.float32)        # conv1.bias (cancels)
    gamma = 1.0 + 0.1 * jax.random.normal(k_g, (N_OUT,), dtype=jnp.float32)
    beta = 0.1 * jax.random.normal(k_be, (N_OUT,), dtype=jnp.float32)

    out = jax.block_until_ready(initial_block(x, w, b, gamma, beta))
    ref = initial_block_ref(x, w, b, gamma, beta)

    l_out = (L + 2 - POOL) // POOL + 1
    assert out.shape == (N, N_OUT, l_out), out.shape
    if not jnp.allclose(out, ref, atol=1e-4, rtol=1e-4):
        err = float(jnp.max(jnp.abs(out - ref)))
        raise AssertionError(f"Pallas kernel output does not match reference (max abs err {err})")

    print("KERNEL_OK")
</pallas_src>

<mosaic_0001>
module attributes {stable_mosaic.version = 11 : i64} {
  func.func @_initial_block_kernel(%arg0: i32, %arg1: i32, %arg2: memref<1x3x8x32xf32, #tpu.memory_space<vmem>>, %arg3: memref<256x8xf32, #tpu.memory_space<vmem>>, %arg4: memref<1x256x32xf32, #tpu.memory_space<vmem>>) attributes {dimension_semantics = [#tpu.dimension_semantics<parallel>, #tpu.dimension_semantics<parallel>], iteration_bounds = array<i64: 1, 2>, scalar_prefetch = 0 : i64, scratch_operands = 0 : i64, tpu.core_type = #tpu.core_type<tc>, window_params = [{transform_indices = @transform_0, window_bounds = array<i64: 1, 3, 8, 32>}, {pipeline_mode = #tpu.pipeline_mode<synchronous>, transform_indices = @transform_1, window_bounds = array<i64: 256, 8>}, {transform_indices = @transform_2, window_bounds = array<i64: 1, 256, 32>}]} {
    %c0 = arith.constant 0 : index
    %c0_0 = arith.constant 0 : index
    %0 = vector.load %arg3[%c0, %c0_0] : memref<256x8xf32, #tpu.memory_space<vmem>>, vector<256x8xf32>
    %c0_1 = arith.constant 0 : index
    %c0_2 = arith.constant 0 : index
    %c0_3 = arith.constant 0 : index
    %c0_4 = arith.constant 0 : index
    %1 = vector.load %arg2[%c0_1, %c0_2, %c0_3, %c0_4] : memref<1x3x8x32xf32, #tpu.memory_space<vmem>>, vector<1x1x8x32xf32>
    %2 = vector.shape_cast %1 : vector<1x1x8x32xf32> to vector<8x32xf32>
    %cst = arith.constant dense<0.000000e+00> : vector<256x32xf32>
    %3 = tpu.matmul %0, %2, %cst {dimension_numbers = #tpu.dot_dimension_numbers<[1], [0], [0], [1], [0, 0, 1, 1], [], []>, precision = #tpu.contract_precision<fp32>} : vector<256x8xf32>, vector<8x32xf32>, vector<256x32xf32> -> vector<256x32xf32>
    %c0_5 = arith.constant 0 : index
    %c1 = arith.constant 1 : index
    %c0_6 = arith.constant 0 : index
    %c0_7 = arith.constant 0 : index
    %4 = vector.load %arg2[%c0_5, %c1, %c0_6, %c0_7] : memref<1x3x8x32xf32, #tpu.memory_space<vmem>>, vector<1x1x8x32xf32>
    %5 = vector.shape_cast %4 : vector<1x1x8x32xf32> to vector<8x32xf32>
    %cst_8 = arith.constant dense<0.000000e+00> : vector<256x32xf32>
    %6 = tpu.matmul %0, %5, %cst_8 {dimension_numbers = #tpu.dot_dimension_numbers<[1], [0], [0], [1], [0, 0, 1, 1], [], []>, precision = #tpu.contract_precision<fp32>} : vector<256x8xf32>, vector<8x32xf32>, vector<256x32xf32> -> vector<256x32xf32>
    %7 = arith.maximumf %3, %6 : vector<256x32xf32>
    %c0_9 = arith.constant 0 : index
    %c2 = arith.constant 2 : index
    %c0_10 = arith.constant 0 : index
    %c0_11 = arith.constant 0 : index
    %8 = vector.load %arg2[%c0_9, %c2, %c0_10, %c0_11] : memref<1x3x8x32xf32, #tpu.memory_space<vmem>>, vector<1x1x8x32xf32>
    %9 = vector.shape_cast %8 : vector<1x1x8x32xf32> to vector<8x32xf32>
    %cst_12 = arith.constant dense<0.000000e+00> : vector<256x32xf32>
    %10 = tpu.matmul %0, %9, %cst_12 {dimension_numbers = #tpu.dot_dimension_numbers<[1], [0], [0], [1], [0, 0, 1, 1], [], []>, precision = #tpu.contract_precision<fp32>} : vector<256x8xf32>, vector<8x32xf32>, vector<256x32xf32> -> vector<256x32xf32>
    %11 = arith.maximumf %7, %10 : vector<256x32xf32>
    %cst_13 = arith.constant 0.000000e+00 : f32
    %12 = vector.broadcast %cst_13 : f32 to vector<256x32xf32>
    %13 = arith.maximumf %11, %12 : vector<256x32xf32>
    %c0_14 = arith.constant 0 : index
    %c0_15 = arith.constant 0 : index
    %c0_16 = arith.constant 0 : index
    %14 = vector.load %arg4[%c0_14, %c0_15, %c0_16] : memref<1x256x32xf32, #tpu.memory_space<vmem>>, vector<1x256x32xf32>
    %15 = vector.shape_cast %14 : vector<1x256x32xf32> to vector<256x32xf32>
    %16 = vector.shape_cast %13 : vector<256x32xf32> to vector<1x256x32xf32>
    tpu.vector_store %arg4[%c0_14, %c0_15, %c0_16], %16 {strides = array<i32>} : memref<1x256x32xf32, #tpu.memory_space<vmem>>, vector<1x256x32xf32>,
    return
  }
  func.func @transform_0(%arg0: i32, %arg1: i32) -> (i32, i32, i32, i32) {
    %c0_i32 = arith.constant 0 : i32
    %c0_i32_0 = arith.constant 0 : i32
    %c0_i32_1 = arith.constant 0 : i32
    return %arg1, %c0_i32, %c0_i32_0, %arg0 : i32, i32, i32, i32
  }
  func.func @transform_1(%arg0: i32, %arg1: i32) -> (i32, i32) {
    %c0_i32 = arith.constant 0 : i32
    %c0_i32_0 = arith.constant 0 : i32
    %c0_i32_1 = arith.constant 0 : i32
    return %c0_i32, %c0_i32_0 : i32, i32
  }
  func.func @transform_2(%arg0: i32, %arg1: i32) -> (i32, i32, i32) {
    %c0_i32 = arith.constant 0 : i32
    %c0_i32_0 = arith.constant 0 : i32
    return %arg1, %c0_i32, %arg0 : i32, i32, i32
  }
}

</mosaic_0001>

<bundles_post_ra>
// kernel: tpu_custom_call.1
= control target key start
LH: loop header
LB: loop body
LE: loop exit
PB: predicated region body
PF: predicated region fallthrough
CT: control target
= control target key end

     0   :  { %s7909_s9 = smov 0   ;;  %s7911_s10 = smov 0   ;;  %s9268_s0 = inlined_call_operand.vmem [shape: f32[2,3,8,32], index: 0, kind: input, shape index: {}]   ;;  %s9269_s1 = inlined_call_operand.vmem [shape: f32[256,8], index: 1, kind: input, shape index: {}]   ;;  %s9270_s2 = inlined_call_operand.vmem [shape: f32[2,256,32], index: 2, kind: output, shape index: {}]  }
   0x1   :  { %s7913_s11 = smov 0  }
   0x2 LB: > { %s21_s12 = sadd.s32 1, %s7888_s10  ;;  %p5862_p0 = scmp.ge.s32.totalorder %s7892_s11, 1  ;;  %s7892_s11 = sphi %s7913_s11, %s12_s11   ;;  %s7888_s10 = sphi %s7911_s10, %s9635_s10   ;;  %s7884_s9 = sphi %s7909_s9, %s9634_s9  }
   0x3   : > { %p22_p1 = scmp.ge.s32.totalorder %s21_s12, 2  ;;  %p131_p2 = scmp.lt.s32.totalorder %s7892_s11, 3 }
   0x5   : > { %s9637_s12 = smov (%p22_p1, %s21_s12), 0  ;;  %p132_p3 = pnand %p5862_p0, %p131_p2 }
   0x7   : > { %135 = sbr.rel (%p132_p3) target bundleno = 819 (0x333), region = 28 }
   0xe   : > { %p159_p4 = scmp.lt.s32.totalorder %s7884_s9, 1  ;;  %v175_v0 = vld [vmem:[%s9269_s1] sm:$0xff]  ;;  %vm208_vm0 = vcmask 64512   ;;  %v176_v1 = vld [vmem:[%s9269_s1 + $0x8] sm:$0xff]  ;;  %v177_v2 = vld [vmem:[%s9269_s1 + $0x10] sm:$0xff]  ;;  %vm5742_vm1 = vcmask 261120  }
   0xf   : > { %v210_v3 = vsel %vm208_vm0, %v175_v0, 0  ;;  %v213_v4 = vsel %vm208_vm0, %v176_v1, 0  ;;  %v216_v5 = vsel %vm208_vm0, %v177_v2, 0  ;;  %v178_v6 = vld [vmem:[%s9269_s1 + $0x18] sm:$0xff]  ;;  %v179_v7 = vld [vmem:[%s9269_s1 + $0x20] sm:$0xff]  ;;  %v180_v8 = vld [vmem:[%s9269_s1 + $0x28] sm:$0xff] }
  0x10   : > { %s9639_s9 = smov (!%p159_p4, %s7884_s9), 1  ;;  %v7950_v9 = vand.u32 4294901760, %v210_v3  ;;  %v7952_v10 = vand.u32 4294901760, %v213_v4  ;;  %v7954_v11 = vand.u32 4294901760, %v216_v5  ;;  %v219_v12 = vsel %vm208_vm0, %v178_v6, 0  ;;  %v181_v13 = vld [vmem:[%s9269_s1 + $0x30] sm:$0xff] }
  0x11   : > { %v7960_v14 = vand.u32 4294901760, %v219_v12  ;;  %v222_v15 = vsel %vm208_vm0, %v179_v7, 0  ;;  %v225_v16 = vsel %vm208_vm0, %v180_v8, 0  ;;  %v228_v17 = vsel %vm208_vm0, %v181_v13, 0  ;;  %v182_v18 = vld [vmem:[%s9269_s1 + $0x38] sm:$0xff]  ;;  %s7845_s29 = smul.u32 24, %s9639_s9 }
  0x12   : > { %v7970_v19 = vsub.f32 %v210_v3, %v7950_v9  ;;  %v7973_v20 = vsub.f32 %v213_v4, %v7952_v10  ;;  %v7976_v21 = vsub.f32 %v216_v5, %v7954_v11  ;;  %v7978_v22 = vand.u32 4294901760, %v222_v15  ;;  %v183_v44 = vld [vmem:[%s9269_s1 + $0x40] sm:$0xff]  ;;  %v184_v45 = vld [vmem:[%s9269_s1 + $0x48] sm:$0xff]  ;;  %v185_v53 = vld [vmem:[%s9269_s1 + $0x50] sm:$0xff] }
  0x13   : > { %v7981_v23 = vsub.f32 %v219_v12, %v7960_v14  ;;  %v7983_v24 = vand.u32 4294901760, %v225_v16  ;;  %v7985_v25 = vand.u32 4294901760, %v228_v17  ;;  %v231_v26 = vsel %vm208_vm0, %v182_v18, 0  ;;  %s7991_s4 = scalar_lea.vmem %s9268_s0, %s7845_s29  ;;  %v186_v58 = vld [vmem:[%s9269_s1 + $0x58] sm:$0xff]  ;;  %v187_v59 = vld [vmem:[%s9269_s1 + $0x60] sm:$0xff]  ;;  %v188_v4 = vld [vmem:[%s9269_s1 + $0x68] sm:$0xff] }
  0x14   : > { %v7994_v27 = vand.u32 4294901760, %v7970_v19  ;;  %v7997_v28 = vand.u32 4294901760, %v7973_v20  ;;  %v8000_v29 = vand.u32 4294901760, %v7976_v21  ;;  %v8003_v30 = vsub.f32 %v222_v15, %v7978_v22  ;;  %v207_v31 = vld [vmem:[%s7991_s4] sm:$0xff] }
  0x15   : > { %v8007_v32 = vand.u32 4294901760, %v7981_v23  ;;  %v8010_v33 = vsub.f32 %v225_v16, %v7983_v24  ;;  %v8013_v34 = vsub.f32 %v228_v17, %v7985_v25  ;;  %v8015_v35 = vand.u32 4294901760, %v231_v26  ;;  %v189_v17 = vld [vmem:[%s9269_s1 + $0x70] sm:$0xff] }
  0x16   : > { %9435 = vst [vmem:[#allocation2_spill] sm:$0xff] %v7994_v27  ;;  %9436 = vst [vmem:[#allocation3_spill] sm:$0xff] %v7997_v28  ;;  %v8017_v36 = vand.u32 4294901760, %v207_v31  ;;  %6617 = vmatprep.mubr.f32.mxu0 %v7994_v27  ;;  %v374_v37 = vsub.f32 %v7970_v19, %v7994_v27  ;;  %v384_v38 = vsub.f32 %v7973_v20, %v7997_v28  ;;  %v8029_v41 = vand.u32 4294901760, %v8003_v30 }
  0x17   : > { %9437 = vst [vmem:[#allocation4_spill] sm:$0xff] %v8000_v29  ;;  %9438 = vst [vmem:[#allocation5_spill] sm:$0xff] %v8003_v30  ;;  %v394_v39 = vsub.f32 %v7976_v21, %v8000_v29  ;;  %v404_v40 = vsub.f32 %v7981_v23, %v8007_v32  ;;  %v8032_v42 = vand.u32 4294901760, %v8010_v33  ;;  %v8035_v43 = vand.u32 4294901760, %v8013_v34 }
  0x18   : > { %9439 = vst [vmem:[#allocation6_spill] sm:$0xff] %v8007_v32  ;;  %9440 = vst [vmem:[#allocation7_spill] sm:$0xff] %v8010_v33  ;;  %6615 = vmatprep.subr.mxu0 %v8017_v36  ;;  %6465 = vmatprep.subr.mxu1 %v8017_v36  ;;  %v8045_v46 = vand.u32 4294901760, %v374_v37  ;;  %v8047_v47 = vand.u32 4294901760, %v384_v38  ;;  %v8052_v49 = vsub.f32 %v207_v31, %v8017_v36  ;;  %v234_v56 = vsel %vm208_vm0, %v183_v44, 0 }
  0x19   : > { %9441 = vst [vmem:[#allocation8_spill] sm:$0xff] %v8013_v34  ;;  %9442 = vst [vmem:[#allocation9_spill] sm:$0xff] %v8029_v41  ;;  %v8049_v48 = vand.u32 4294901760, %v394_v39  ;;  %6616 = vmatpush3.msra.mxu0 %v8017_v36  ;;  %6466 = vmatpush3.msra.mxu1 %v8017_v36  ;;  %v8056_v50 = vand.u32 4294901760, %v404_v40  ;;  %v414_v51 = vsub.f32 %v8003_v30, %v8029_v41  ;;  %v237_v57 = vsel %vm208_vm0, %v184_v45, 0  ;;  %v190_v45 = vld [vmem:[%s9269_s1 + $0x78] sm:$0xff] }
  0x1a   : > { %9443 = vst [vmem:[#allocation10_spill] sm:$0xff] %v8032_v42  ;;  %9444 = vst [vmem:[#allocation11_spill] sm:$0xff] %v8035_v43  ;;  %v424_v52 = vsub.f32 %v8010_v33, %v8032_v42  ;;  %6467 = vmatprep.mubr.f32.mxu1 %v8045_v46  ;;  %6618 = vmatmul.mubr.f32.vlgmr.msra.gmra.mrb[0].mxu0 %v7997_v28  ;;  %v694_v54 = vand.u32 4294901760, %v8052_v49  ;;  %v8069_v55 = vsub.f32 %v231_v26, %v8015_v35 }
  0x1b   : > { %9445 = vst [vmem:[#allocation12_spill] sm:$0xff] %v8045_v46  ;;  %9446 = vst [vmem:[#allocation13_spill] sm:$0xff] %v8047_v47  ;;  %6468 = vmatmul.mubr.f32.vlgmr.msra.gmra.mrb[0].mxu1 %v8047_v47  ;;  %6620 = vmatprep.mubr.f32.mxu0 %v8000_v29  ;;  %v8081_v60 = vand.u32 4294901760, %v414_v51  ;;  %v434_v62 = vsub.f32 %v8013_v34, %v8035_v43  ;;  %v8087_v63 = vand.u32 4294901760, %v234_v56  ;;  %v8094_v2 = vand.u32 4294901760, %v237_v57 }
  0x1c   : > { %9447 = vst [vmem:[#allocation14_spill] sm:$0xff] %v8049_v48  ;;  %9448 = vst [vmem:[#allocation15_spill] sm:$0xff] %v8056_v50  ;;  %v8083_v61 = vand.u32 4294901760, %v424_v52  ;;  %6470 = vmatprep.mubr.f32.mxu1 %v8049_v48  ;;  %v695_v0 = vsub.f32 %v8052_v49, %v694_v54  ;;  %6665 = vmatprep.subr.mxu0 %v694_v54  ;;  %v8092_v1 = vand.u32 4294901760, %v8069_v55  ;;  %v240_v3 = vsel %vm208_vm0, %v185_v53, 0 }
  0x1d   : > { %9449 = vst [vmem:[#allocation16_spill] sm:$0xff] %v8069_v55  ;;  %9450 = vst [vmem:[#allocation17_spill] sm:$0xff] %v8081_v60  ;;  %6666 = vmatpush3.msra.mxu0 %v694_v54  ;;  %v8101_v5 = vsub.f32 %v234_v56, %v8087_v63  ;;  %v8103_v6 = vand.u32 4294901760, %v240_v3  ;;  %v243_v7 = vsel %vm208_vm0, %v186_v58, 0  ;;  %v246_v8 = vsel %vm208_vm0, %v187_v59, 0 }
  0x1e   : > { %9451 = vst [vmem:[#allocation18_spill] sm:$0xff] %v8083_v61  ;;  %9452 = vst [vmem:[#allocation19_spill] sm:$0xff] %v8092_v1  ;;  %6621 = vmatmul.mubr.f32.gmra.mrb[2].mxu0 %v8007_v32  ;;  %v696_v12 = vand.u32 4294901760, %v695_v0  ;;  %v444_v13 = vsub.f32 %v8069_v55, %v8092_v1  ;;  %v8111_v15 = vsub.f32 %v237_v57, %v8094_v2  ;;  %v8113_v16 = vand.u32 4294901760, %v243_v7 }
  0x1f   : > { %9453 = vst [vmem:[#allocation20_spill] sm:$0xff] %v8101_v5  ;;  %6715 = vmatprep.subr.mxu0 %v8017_v36  ;;  %6471 = vmatmul.mubr.f32.gmra.mrb[2].mxu1 %v8056_v50  ;;  %v8122_v18 = vand.u32 4294901760, %v8101_v5  ;;  %v8125_v26 = vsub.f32 %v240_v3, %v8103_v6  ;;  %v8127_v31 = vand.u32 4294901760, %v246_v8  ;;  %v249_v37 = vsel %vm208_vm0, %v188_v4, 0 }
  0x20   : > { %9454 = vst [vmem:[#allocation21_spill] sm:$0xff] %v8111_v15  ;;  %6623 = vmatprep.mubr.f32.mxu0 %v8029_v41  ;;  %6515 = vmatprep.subr.mxu1 %v696_v12  ;;  %v8131_v38 = vand.u32 4294901760, %v434_v62  ;;  %v8134_v39 = vand.u32 4294901760, %v8111_v15  ;;  %v8137_v40 = vsub.f32 %v243_v7, %v8113_v16  ;;  %v8139_v44 = vand.u32 4294901760, %v249_v37  ;;  %v191_v62 = vld [vmem:[%s9269_s1 + $0x80] sm:$0xff]  ;;  %v194_v41 = vld [vmem:[%s9269_s1 + $0x98] sm:$0xff] }
  0x21   : > { %9455 = vst [vmem:[#allocation22_spill] sm:$0xff] %v8122_v18  ;;  %9456 = vst [vmem:[#allocation23_spill] sm:$0xff] %v8125_v26  ;;  %6473 = vmatprep.mubr.f32.mxu1 %v8081_v60  ;;  %6516 = vmatpush3.msra.mxu1 %v696_v12  ;;  %v454_v51 = vsub.f32 %v8101_v5, %v8122_v18  ;;  %v8147_v52 = vand.u32 4294901760, %v8125_v26  ;;  %v8150_v53 = vsub.f32 %v246_v8, %v8127_v31 }
  0x22   : > { %9457 = vst [vmem:[#allocation24_spill] sm:$0xff] %v8131_v38  ;;  %9458 = vst [vmem:[#allocation25_spill] sm:$0xff] %v8134_v39  ;;  %v252_v54 = vsel %vm208_vm0, %v189_v17, 0  ;;  %6624 = vmatmul.mubr.f32.gmra.mrb[4].mxu0 %v8032_v42  ;;  %v464_v56 = vsub.f32 %v8111_v15, %v8134_v39  ;;  %v8157_v57 = vand.u32 4294901760, %v8137_v40  ;;  %v8160_v58 = vsub.f32 %v249_v37, %v8139_v44  ;;  %v193_v17 = vld [vmem:[%s9269_s1 + $0x90] sm:$0xff] }
  0x23   : > { %9459 = vst [vmem:[#allocation26_spill] sm:$0xff] %v8137_v40  ;;  %9460 = vst [vmem:[#allocation27_spill] sm:$0xff] %v8147_v52  ;;  %v8162_v59 = vand.u32 4294901760, %v252_v54  ;;  %6565 = vmatprep.subr.mxu1 %v8052_v49  ;;  %6474 = vmatmul.mubr.f32.gmra.mrb[4].mxu1 %v8083_v61  ;;  %v8170_v0 = vand.u32 4294901760, %v444_v13  ;;  %v8173_v3 = vand.u32 4294901760, %v8150_v53  ;;  %v255_v4 = vsel %vm208_vm0, %v190_v45, 0 }
  0x24   : > { %9461 = vst [vmem:[#allocation28_spill] sm:$0xff] %v8150_v53  ;;  %9462 = vst [vmem:[#allocation29_spill] sm:$0xff] %v8157_v57  ;;  %6626 = vmatprep.mubr.f32.mxu0 %v8035_v43  ;;  %6476 = vmatprep.mubr.f32.mxu1 %v8131_v38  ;;  %v8177_v7 = vand.u32 4294901760, %v454_v51  ;;  %v474_v8 = vsub.f32 %v8125_v26, %v8147_v52  ;;  %v192_v13 = vld [vmem:[%s9269_s1 + $0x88] sm:$0xff]  ;;  %v8190_v37 = vand.u32 4294901760, %v255_v4  ;;  %v258_v45 = vsel %vm208_vm0, %v191_v62, 0 }
  0x25   : > { %9463 = vst [vmem:[#allocation30_spill] sm:$0xff] %v8160_v58  ;;  %9464 = vst [vmem:[#allocation31_spill] sm:$0xff] %v8170_v0  ;;  %v8182_v12 = vsub.f32 %v252_v54, %v8162_v59  ;;  %v8194_v51 = vand.u32 4294901760, %v464_v56  ;;  %v484_v54 = vsub.f32 %v8137_v40, %v8157_v57  ;;  %v8199_v43 = vand.u32 4294901760, %v8160_v58  ;;  %v195_v62 = vld [vmem:[%s9269_s1 + $0xa0] sm:$0xff]  ;;  %v197_v61 = vld [vmem:[%s9269_s1 + $0xb0] sm:$0xff] }
  0x26   : > { %9465 = vst [vmem:[#allocation32_spill] sm:$0xff] %v8173_v3  ;;  %9466 = vst [vmem:[#allocation33_spill] sm:$0xff] %v8177_v7  ;;  %6627 = vmatmul.mubr.f32.gmra.mrb[6].mxu0 %v8092_v1  ;;  %v8201_v42 = vand.u32 4294901760, %v258_v45  ;;  %v494_v56 = vsub.f32 %v8150_v53, %v8173_v3  ;;  %v8214_v1 = vsub.f32 %v255_v4, %v8190_v37  ;;  %v261_v32 = vsel %vm208_vm0, %v192_v13, 0  ;;  %v196_v4 = vld [vmem:[%s9269_s1 + $0xa8] sm:$0xff] }
  0x27   : > { %9467 = vst [vmem:[#allocation34_spill] sm:$0xff] %v8182_v12  ;;  %9468 = vst [vmem:[#allocation35_spill] sm:$0xff] %v8194_v51  ;;  %6477 = vmatmul.mubr.f32.gmra.mrb[6].mxu1 %v8170_v0  ;;  %6629 = vmatprep.mubr.f32.mxu0 %v8122_v18  ;;  %v264_v29 = vsel %vm208_vm0, %v193_v17, 0  ;;  %v8219_v28 = vand.u32 4294901760, %v474_v8  ;;  %v8222_v27 = vand.u32 4294901760, %v8182_v12  ;;  %v8227_v18 = vand.u32 4294901760, %v261_v32 }
  0x28   : > { %9469 = vst [vmem:[#allocation36_spill] sm:$0xff] %v8199_v43  ;;  %9470 = vst [vmem:[#allocation37_spill] sm:$0xff] %v8214_v1  ;;  %6479 = vmatprep.mubr.f32.mxu1 %v8177_v7  ;;  %v8225_v0 = vsub.f32 %v258_v45, %v8201_v42  ;;  %v8232_v38 = vand.u32 4294901760, %v264_v29  ;;  %v267_v13 = vsel %vm208_vm0, %v194_v41, 0  ;;  %v270_v17 = vsel %vm208_vm0, %v195_v62, 0 }
  0x29   : > { %9471 = vst [vmem:[#allocation38_spill] sm:$0xff] %v8219_v28  ;;  %9472 = vst [vmem:[#allocation39_spill] sm:$0xff] %v8222_v27  ;;  %v8237_v8 = vand.u32 4294901760, %v484_v54  ;;  %v504_v45 = vsub.f32 %v8160_v58, %v8199_v43  ;;  %v8242_v7 = vand.u32 4294901760, %v8214_v1  ;;  %v8249_v41 = vand.u32 4294901760, %v494_v56 }
  0x2a   : > { %9473 = vst [vmem:[#allocation40_spill] sm:$0xff] %v8225_v0  ;;  %6630 = vmatmul.mubr.f32.gmra.mrb[8].mxu0 %v8134_v39  ;;  %v8252_v62 = vsub.f32 %v261_v32, %v8227_v18  ;;  %v8254_v54 = vand.u32 4294901760, %v267_v13  ;;  %v273_v39 = vsel %vm208_vm0, %v196_v4, 0  ;;  %v514_v60 = vsub.f32 %v8182_v12, %v8222_v27  ;;  %v198_v32 = vld [vmem:[%s9269_s1 + $0xb8] sm:$0xff]  ;;  %v200_v12 = vld [vmem:[%s9269_s1 + $0xc8] sm:$0xff] }
  0x2b   : > { %9474 = vst [vmem:[#allocation41_spill] sm:$0xff] %v8237_v8  ;;  %9475 = vst [vmem:[#allocation42_spill] sm:$0xff] %v8242_v7  ;;  %6480 = vmatmul.mubr.f32.gmra.mrb[8].mxu1 %v8194_v51  ;;  %6632 = vmatprep.mubr.f32.mxu0 %v8147_v52  ;;  %v8261_v50 = vand.u32 4294901760, %v8225_v0  ;;  %v8264_v51 = vsub.f32 %v264_v29, %v8232_v38  ;;  %v8266_v56 = vand.u32 4294901760, %v270_v17  ;;  %v276_v52 = vsel %vm208_vm0, %v197_v61, 0  ;;  %v199_v29 = vld [vmem:[%s9269_s1 + $0xc0] sm:$0xff] }
  0x2c   : > { %9476 = vst [vmem:[#allocation43_spill] sm:$0xff] %v8249_v41  ;;  %9477 = vst [vmem:[#allocation44_spill] sm:$0xff] %v8252_v62  ;;  %6482 = vmatprep.mubr.f32.mxu1 %v8219_v28  ;;  %v8273_v4 = vand.u32 4294901760, %v504_v45  ;;  %v524_v28 = vsub.f32 %v8214_v1, %v8242_v7  ;;  %v8277_v48 = vand.u32 4294901760, %v273_v39  ;;  %v8285_v47 = vand.u32 4294901760, %v8252_v62 }
  0x2d   : > { %9478 = vst [vmem:[#allocation45_spill] sm:$0xff] %v8261_v50  ;;  %9479 = vst [vmem:[#allocation46_spill] sm:$0xff] %v8264_v51  ;;  %v8288_v61 = vsub.f32 %v267_v13, %v8254_v54  ;;  %v8290_v45 = vand.u32 4294901760, %v276_v52  ;;  %v8294_v46 = vand.u32 4294901760, %v514_v60  ;;  %v534_v1 = vsub.f32 %v8225_v0, %v8261_v50 }
  0x2e   : > { %6633 = vmatmul.mubr.f32.gmra.mrb[10].mxu0 %v8157_v57  ;;  %9480 = vst [vmem:[#allocation47_spill] sm:$0xff] %v8273_v4  ;;  %9481 = vst [vmem:[#allocation48_spill] sm:$0xff] %v8285_v47  ;;  %v279_v57 = vsel %vm208_vm0, %v198_v32, 0  ;;  %v282_v13 = vsel %vm208_vm0, %v199_v29, 0  ;;  %v8310_v60 = vsub.f32 %v273_v39, %v8277_v48  ;;  %v8322_v29 = vand.u32 4294901760, %v524_v28 }
  0x2f   : > { %6483 = vmatmul.mubr.f32.gmra.mrb[10].mxu1 %v8237_v8  ;;  %6635 = vmatprep.mubr.f32.mxu0 %v8173_v3  ;;  %9482 = vst [vmem:[#allocation49_spill] sm:$0xff] %v8288_v61  ;;  %9483 = vst [vmem:[#allocation50_spill] sm:$0xff] %v8294_v46  ;;  %v8299_v8 = vand.u32 4294901760, %v8264_v51  ;;  %v8302_v3 = vsub.f32 %v270_v17, %v8266_v56  ;;  %v8313_v32 = vsub.f32 %v276_v52, %v8290_v45  ;;  %v201_v17 = vld [vmem:[%s9269_s1 + $0xd0] sm:$0xff] }
  0x30   : > { %6485 = vmatprep.mubr.f32.mxu1 %v8249_v41  ;;  %9486 = vst [vmem:[#allocation53_spill] sm:$0xff] %v8310_v60  ;;  %v8315_v41 = vand.u32 4294901760, %v279_v57  ;;  %9488 = vst [vmem:[#allocation55_spill] sm:$0xff] %v8322_v29  ;;  %v8327_v39 = vand.u32 4294901760, %v8288_v61  ;;  %v8329_v52 = vand.u32 4294901760, %v282_v13  ;;  %v8332_v0 = vand.u32 4294901760, %v534_v1 }
  0x31   : > { %9484 = vst [vmem:[#allocation51_spill] sm:$0xff] %v8299_v8  ;;  %9485 = vst [vmem:[#allocation52_spill] sm:$0xff] %v8302_v3  ;;  %v554_v58 = vsub.f32 %v8264_v51, %v8299_v8  ;;  %v285_v28 = vsel %vm208_vm0, %v200_v12, 0  ;;  %v8349_v1 = vand.u32 4294901760, %v8313_v32  ;;  %v203_v12 = vld [vmem:[%s9269_s1 + $0xe0] sm:$0xff] }
  0x32   : > { %6636 = vmatmul.mubr.f32.gmra.mrb[12].mxu0 %v8199_v43  ;;  %9487 = vst [vmem:[#allocation54_spill] sm:$0xff] %v8313_v32  ;;  %v544_v43 = vsub.f32 %v8252_v62, %v8285_v47  ;;  %9489 = vst [vmem:[#allocation56_spill] sm:$0xff] %v8327_v39  ;;  %v202_v62 = vld [vmem:[%s9269_s1 + $0xd8] sm:$0xff]  ;;  %v8352_v51 = vsub.f32 %v279_v57, %v8315_v41  ;;  %v8364_v53 = vsub.f32 %v282_v13, %v8329_v52  ;;  %v204_v13 = vld [vmem:[%s9269_s1 + $0xe8] sm:$0xff] }
  0x33   : > { %6486 = vmatmul.mubr.f32.gmra.mrb[12].mxu1 %v8273_v4  ;;  %6638 = vmatprep.mubr.f32.mxu0 %v8222_v27  ;;  %9490 = vst [vmem:[#allocation57_spill] sm:$0xff] %v8332_v0  ;;  %v8337_v4 = vand.u32 4294901760, %v8302_v3  ;;  %v288_v27 = vsel %vm208_vm0, %v201_v17, 0  ;;  %9493 = vst [vmem:[#allocation60_spill] sm:$0xff] %v8349_v1  ;;  %v8366_v40 = vand.u32 4294901760, %v285_v28  ;;  %v8369_v57 = vand.u32 4294901760, %v554_v58 }
  0x34   : > { %6488 = vmatprep.mubr.f32.mxu1 %v8294_v46  ;;  %v8346_v46 = vand.u32 4294901760, %v8310_v60  ;;  %9494 = vst [vmem:[#allocation61_spill] sm:$0xff] %v8352_v51  ;;  %v8359_v17 = vand.u32 4294901760, %v544_v43  ;;  %9496 = vst [vmem:[#allocation63_spill] sm:$0xff] %v8364_v53  ;;  %v291_v43 = vsel %vm208_vm0, %v202_v62, 0  ;;  %v594_v58 = vsub.f32 %v8313_v32, %v8349_v1  ;;  %v205_v62 = vld [vmem:[%s9269_s1 + $0xf0] sm:$0xff] }
  0x35   : > { %9491 = vst [vmem:[#allocation58_spill] sm:$0xff] %v8337_v4  ;;  %9497 = vst [vmem:[#allocation64_spill] sm:$0xff] %v8369_v57  ;;  %v574_v26 = vsub.f32 %v8302_v3, %v8337_v4  ;;  %v8386_v3 = vand.u32 4294901760, %v8352_v51  ;;  %v8401_v32 = vand.u32 4294901760, %v291_v43 }
  0x36   : > { %6639 = vmatmul.mubr.f32.gmra.mrb[14].mxu0 %v8242_v7  ;;  %9492 = vst [vmem:[#allocation59_spill] sm:$0xff] %v8346_v46  ;;  %9495 = vst [vmem:[#allocation62_spill] sm:$0xff] %v8359_v17  ;;  %v564_v7 = vsub.f32 %v8288_v61, %v8327_v39 }
  0x37   : > { %6489 = vmatmul.mubr.f32.gmra.mrb[14].mxu1 %v8322_v29  ;;  %6641 = vmatprep.mubr.f32.mxu0 %v8261_v50  ;;  %v8373_v29 = vand.u32 4294901760, %v288_v27  ;;  %v294_v50 = vsel %vm208_vm0, %v203_v12, 0  ;;  %9498 = vst [vmem:[#allocation65_spill] sm:$0xff] %v8386_v3  ;;  %v8404_v61 = vand.u32 4294901760, %v574_v26 }
  0x38   : > { %6491 = vmatprep.mubr.f32.mxu1 %v8332_v0  ;;  %v584_v0 = vsub.f32 %v8310_v60, %v8346_v46  ;;  %v8393_v12 = vand.u32 4294901760, %v564_v7  ;;  %v8399_v60 = vsub.f32 %v285_v28, %v8366_v40  ;;  %v297_v7 = vsel %vm208_vm0, %v204_v13, 0  ;;  %v206_v28 = vld [vmem:[%s9269_s1 + $0xf8] sm:$0xff] }
  0x39   : > { %9501 = vst [vmem:[#allocation68_spill] sm:$0xff] %v8404_v61  ;;  %v8407_v15 = vsub.f32 %v288_v27, %v8373_v29  ;;  %v604_v27 = vsub.f32 %v8352_v51, %v8386_v3 }
  0x3a   : > { %6642 = vmatmul.mubr.f32.gmra.mrb[16].mxu0 %v8285_v47  ;;  %9499 = vst [vmem:[#allocation66_spill] sm:$0xff] %v8393_v12  ;;  %v8396_v47 = vand.u32 4294901760, %v8364_v53  ;;  %v8417_v5 = vand.u32 4294901760, %v584_v0  ;;  %v8428_v13 = vand.u32 4294901760, %v8399_v60  ;;  %v8433_v0 = vand.u32 4294901760, %v297_v7 }
  0x3b   : > { %6492 = vmatmul.mubr.f32.gmra.mrb[16].mxu1 %v8359_v17  ;;  %6644 = vmatprep.mubr.f32.mxu0 %v8299_v8  ;;  %9502 = vst [vmem:[#allocation69_spill] sm:$0xff] %v8407_v15  ;;  %v8409_v17 = vand.u32 4294901760, %v294_v50  ;;  %v300_v8 = vsel %vm208_vm0, %v205_v62, 0  ;;  %v8431_v62 = vsub.f32 %v291_v43, %v8401_v32 }
  0x3c   : > { %9500 = vst [vmem:[#allocation67_spill] sm:$0xff] %v8396_v47  ;;  %6494 = vmatprep.mubr.f32.mxu1 %v8369_v57  ;;  %9503 = vst [vmem:[#allocation70_spill] sm:$0xff] %v8417_v5  ;;  %v8419_v57 = vand.u32 4294901760, %v594_v58  ;;  %v614_v26 = vsub.f32 %v8364_v53, %v8396_v47  ;;  %v8437_v58 = vand.u32 4294901760, %v8407_v15  ;;  %v8446_v53 = vand.u32 4294901760, %v604_v27 }
  0x3d   : > { %9505 = vst [vmem:[#allocation72_spill] sm:$0xff] %v8428_v13  ;;  %9506 = vst [vmem:[#allocation73_spill] sm:$0xff] %v8431_v62  ;;  %v624_v43 = vsub.f32 %v8399_v60, %v8428_v13 }
  0x3e   : > { %6645 = vmatmul.mubr.f32.gmra.mrb[18].mxu0 %v8327_v39  ;;  %9504 = vst [vmem:[#allocation71_spill] sm:$0xff] %v8419_v57  ;;  %9507 = vst [vmem:[#allocation74_spill] sm:$0xff] %v8437_v58  ;;  %v8440_v39 = vsub.f32 %v294_v50, %v8409_v17  ;;  %v8456_v50 = vsub.f32 %v297_v7, %v8433_v0  ;;  %v634_v27 = vsub.f32 %v8407_v15, %v8437_v58 }
  0x3f   : > { %6495 = vmatmul.mubr.f32.gmra.mrb[18].mxu1 %v8393_v12  ;;  %6647 = vmatprep.mubr.f32.mxu0 %v8337_v4  ;;  %v8442_v4 = vand.u32 4294901760, %v300_v8  ;;  %v303_v12 = vsel %vm208_vm0, %v206_v28, 0  ;;  %v8461_v28 = vand.u32 4294901760, %v614_v26  ;;  %v8474_v7 = vand.u32 4294901760, %v624_v43 }
  0x40   : > { %6497 = vmatprep.mubr.f32.mxu1 %v8404_v61  ;;  %9508 = vst [vmem:[#allocation75_spill] sm:$0xff] %v8440_v39  ;;  %v8453_v61 = vand.u32 4294901760, %v8431_v62  ;;  %v8458_v51 = vand.u32 4294901760, %v303_v12 }
  0x41   : > { %9510 = vst [vmem:[#allocation77_spill] sm:$0xff] %v8461_v28 }
  0x42   : > { %6648 = vmatmul.mubr.f32.gmra.mrb[20].mxu0 %v8346_v46  ;;  %9509 = vst [vmem:[#allocation76_spill] sm:$0xff] %v8453_v61  ;;  %v8469_v46 = vsub.f32 %v300_v8, %v8442_v4  ;;  %v644_v26 = vsub.f32 %v8431_v62, %v8453_v61  ;;  %v8485_v8 = vand.u32 4294901760, %v634_v27 }
  0x43   : > { %6498 = vmatmul.mubr.f32.gmra.mrb[20].mxu1 %v8417_v5  ;;  %6650 = vmatprep.mubr.f32.mxu0 %v8349_v1  ;;  %v8466_v1 = vand.u32 4294901760, %v8440_v39  ;;  %v8482_v5 = vsub.f32 %v303_v12, %v8458_v51 }
  0x44   : > { %6500 = vmatprep.mubr.f32.mxu1 %v8419_v57  ;;  %9512 = vst [vmem:[#allocation79_spill] sm:$0xff] %v8469_v46  ;;  %v8479_v57 = vand.u32 4294901760, %v8456_v50  ;;  %9514 = vst [vmem:[#allocation81_spill] sm:$0xff] %v8485_v8  ;;  %v8495_v43 = vand.u32 4294901760, %v644_v26 }
  0x45   : > { %9511 = vst [vmem:[#allocation78_spill] sm:$0xff] %v8466_v1  ;;  %v8500_v27 = vand.u32 4294901760, %v8482_v5 }
  0x46   : > { %6651 = vmatmul.mubr.f32.gmra.mrb[22].mxu0 %v8386_v3  ;;  %9513 = vst [vmem:[#allocation80_spill] sm:$0xff] %v8479_v57  ;;  %v654_v3 = vsub.f32 %v8440_v39, %v8466_v1  ;;  %v664_v12 = vsub.f32 %v8456_v50, %v8479_v57 }
  0x47   : > { %6501 = vmatmul.mubr.f32.gmra.mrb[22].mxu1 %v8446_v53  ;;  %6653 = vmatprep.mubr.f32.mxu0 %v8396_v47  ;;  %v8490_v47 = vand.u32 4294901760, %v8469_v46  ;;  %9516 = vst [vmem:[#allocation83_spill] sm:$0xff] %v8500_v27 }
  0x48   : > { %6503 = vmatprep.mubr.f32.mxu1 %v8461_v28  ;;  %v8503_v28 = vand.u32 4294901760, %v654_v3  ;;  %v8510_v26 = vand.u32 4294901760, %v664_v12  ;;  %v8525_v12 = vld [vmem:[%s7991_s4 + $0x8] sm:$0xff] }
  0x49   : > { %9515 = vst [vmem:[#allocation82_spill] sm:$0xff] %v8490_v47 }
  0x4a   : > { %6654 = vmatmul.mubr.f32.gmra.mrb[24].mxu0 %v8428_v13  ;;  %v674_v13 = vsub.f32 %v8469_v46, %v8490_v47 }
  0x4b   : > { %6504 = vmatmul.mubr.f32.gmra.mrb[24].mxu1 %v8474_v7  ;;  %6656 = vmatprep.mubr.f32.mxu0 %v8437_v58  ;;  %v684_v58 = vsub.f32 %v8482_v5, %v8500_v27 }
  0x4c   : > { %6506 = vmatprep.mubr.f32.mxu1 %v8485_v8  ;;  %v8515_v8 = vand.u32 4294901760, %v674_v13  ;;  %v5867_v13 = vld [vmem:[%s7991_s4 + $0x10] sm:$0xff]  ;;  %s5870_s4 = sshll.u32 %s9639_s9, 8 }
  0x4d   : > { %v8520_v3 = vand.u32 4294901760, %v684_v58  ;;  %v8535_v58 = vand.u32 4294901760, %v5867_v13  ;;  %s9163_s13 = scalar_lea.vmem %s9270_s2, %s5870_s4 }
  0x4e   : > { %6657 = vmatmul.mubr.f32.gmra.mrb[26].mxu0 %v8453_v61 }
  0x4f   : > { %6507 = vmatmul.mubr.f32.gmra.mrb[26].mxu1 %v8495_v43  ;;  %6659 = vmatprep.mubr.f32.mxu0 %v8466_v1 }
  0x50   : > { %6509 = vmatprep.mubr.f32.mxu1 %v8503_v28 }
  0x52   : > { %6660 = vmatmul.mubr.f32.gmra.mrb[28].mxu0 %v8479_v57  ;;  %v8532_v57 = vand.u32 4294901760, %v8525_v12 }
  0x53   : > { %6510 = vmatmul.mubr.f32.gmra.mrb[28].mxu1 %v8510_v26  ;;  %6662 = vmatprep.mubr.f32.mxu0 %v8490_v47 }
  0x54   : > { %6512 = vmatprep.mubr.f32.mxu1 %v8515_v8 }
  0x56   : > { %6663 = vmatmul.mubr.f32.gmra.mrb[30].mxu0 %v8500_v27 }
  0x57   : > { %6513 = vmatmul.mubr.f32.gmra.mrb[30].mxu1 %v8520_v3  ;;  %6667 = vmatprep.mubr.f32.mxu0 %v7950_v9 }
  0x58   : > { %6517 = vmatprep.mubr.f32.mxu1 %v7950_v9 }
  0x5a   : > { %6668 = vmatmul.mubr.f32.vlgmr.msra.gmra.mrb[0].mxu0 %v7952_v10 }
  0x5b   : > { %6518 = vmatmul.mubr.f32.vlgmr.msra.gmra.mrb[0].mxu1 %v7952_v10  ;;  %6670 = vmatprep.mubr.f32.mxu0 %v7954_v11 }
  0x5c   : > { %6520 = vmatprep.mubr.f32.mxu1 %v7954_v11  ;;  %6566 = vmatpush3.msra.mxu1 %v8052_v49  ;;  %v8598_v49 = vsub.f32 %v5867_v13, %v8535_v58 }
  0x5d   : > { %6716 = vmatpush3.msra.mxu0 %v8017_v36  ;;  %6765 = vmatprep.subr.mxu1 %v8532_v57  ;;  %v8594_v36 = vsub.f32 %v8525_v12, %v8532_v57 }
  0x5e   : > { %6671 = vmatmul.mubr.f32.gmra.mrb[2].mxu0 %v7960_v14  ;;  %7065 = vmatprep.subr.mxu0 %v8535_v58  ;;  %v8608_v47 = vand.u32 4294901760, %v8598_v49 }
  0x5f   : > { %6521 = vmatmul.mubr.f32.gmra.mrb[2].mxu1 %v7960_v14  ;;  %6673 = vmatprep.mubr.f32.mxu0 %v7978_v22  ;;  %v8604_v27 = vand.u32 4294901760, %v8594_v36 }
  0x60   : > { %6523 = vmatprep.mubr.f32.mxu1 %v7978_v22  ;;  %v4289_v13 = vsub.f32 %v8598_v49, %v8608_v47 }
  0x61   : > { %v2476_v12 = vsub.f32 %v8594_v36, %v8604_v27 }
  0x62   : > { %6674 = vmatmul.mubr.f32.gmra.mrb[4].mxu0 %v7983_v24  ;;  %v8624_v61 = vand.u32 4294901760, %v4289_v13  ;;  %v9518_v13 = vld [vmem:[#allocation21_spill] sm:$0xff] }
  0x63   : > { %6524 = vmatmul.mubr.f32.gmra.mrb[4].mxu1 %v7983_v24  ;;  %6676 = vmatprep.mubr.f32.mxu0 %v7985_v25  ;;  %v8621_v1 = vand.u32 4294901760, %v2476_v12  ;;  %v9517_v12 = vld [vmem:[#allocation20_spill] sm:$0xff] }
  0x64   : > { %6526 = vmatprep.mubr.f32.mxu1 %v7985_v25 }
  0x66   : > { %6677 = vmatmul.mubr.f32.gmra.mrb[6].mxu0 %v8015_v35 }
  0x67   : > { %6527 = vmatmul.mubr.f32.gmra.mrb[6].mxu1 %v8015_v35  ;;  %6679 = vmatprep.mubr.f32.mxu0 %v8087_v63 }
  0x68   : > { %6529 = vmatprep.mubr.f32.mxu1 %v8087_v63 }
  0x6a   : > { %6680 = vmatmul.mubr.f32.gmra.mrb[8].mxu0 %v8094_v2 }
  0x6b   : > { %6530 = vmatmul.mubr.f32.gmra.mrb[8].mxu1 %v8094_v2  ;;  %6682 = vmatprep.mubr.f32.mxu0 %v8103_v6 }
  0x6c   : > { %6532 = vmatprep.mubr.f32.mxu1 %v8103_v6 }
  0x6e   : > { %6683 = vmatmul.mubr.f32.gmra.mrb[10].mxu0 %v8113_v16 }
  0x6f   : > { %6533 = vmatmul.mubr.f32.gmra.mrb[10].mxu1 %v8113_v16  ;;  %6685 = vmatprep.mubr.f32.mxu0 %v8127_v31 }
  0x70   : > { %6535 = vmatprep.mubr.f32.mxu1 %v8127_v31 }
  0x72   : > { %6686 = vmatmul.mubr.f32.gmra.mrb[12].mxu0 %v8139_v44 }
  0x73   : > { %6536 = vmatmul.mubr.f32.gmra.mrb[12].mxu1 %v8139_v44  ;;  %6688 = vmatprep.mubr.f32.mxu0 %v8162_v59 }
  0x74   : > { %6538 = vmatprep.mubr.f32.mxu1 %v8162_v59 }
  0x76   : > { %6689 = vmatmul.mubr.f32.gmra.mrb[14].mxu0 %v8190_v37 }
  0x77   : > { %6539 = vmatmul.mubr.f32.gmra.mrb[14].mxu1 %v8190_v37  ;;  %6691 = vmatprep.mubr.f32.mxu0 %v8201_v42 }
  0x78   : > { %6541 = vmatprep.mubr.f32.mxu1 %v8201_v42 }
  0x7a   : > { %6692 = vmatmul.mubr.f32.gmra.mrb[16].mxu0 %v8227_v18 }
  0x7b   : > { %6542 = vmatmul.mubr.f32.gmra.mrb[16].mxu1 %v8227_v18  ;;  %6694 = vmatprep.mubr.f32.mxu0 %v8232_v38 }
  0x7c   : > { %6544 = vmatprep.mubr.f32.mxu1 %v8232_v38 }
  0x7e   : > { %6695 = vmatmul.mubr.f32.gmra.mrb[18].mxu0 %v8254_v54 }
  0x7f   : > { %6545 = vmatmul.mubr.f32.gmra.mrb[18].mxu1 %v8254_v54  ;;  %6697 = vmatprep.mubr.f32.mxu0 %v8266_v56 }
  0x80   : > { %6547 = vmatprep.mubr.f32.mxu1 %v8266_v56 }
  0x82   : > { %6698 = vmatmul.mubr.f32.gmra.mrb[20].mxu0 %v8277_v48 }
  0x83   : > { %6548 = vmatmul.mubr.f32.gmra.mrb[20].mxu1 %v8277_v48  ;;  %6700 = vmatprep.mubr.f32.mxu0 %v8290_v45 }
  0x84   : > { %6550 = vmatprep.mubr.f32.mxu1 %v8290_v45 }
  0x86   : > { %6701 = vmatmul.mubr.f32.gmra.mrb[22].mxu0 %v8315_v41 }
  0x87   : > { %6551 = vmatmul.mubr.f32.gmra.mrb[22].mxu1 %v8315_v41  ;;  %6703 = vmatprep.mubr.f32.mxu0 %v8329_v52 }
  0x88   : > { %6553 = vmatprep.mubr.f32.mxu1 %v8329_v52 }
  0x8a   : > { %6704 = vmatmul.mubr.f32.gmra.mrb[24].mxu0 %v8366_v40 }
  0x8b   : > { %6554 = vmatmul.mubr.f32.gmra.mrb[24].mxu1 %v8366_v40  ;;  %6706 = vmatprep.mubr.f32.mxu0 %v8373_v29 }
  0x8c   : > { %6556 = vmatprep.mubr.f32.mxu1 %v8373_v29 }
  0x8e   : > { %6707 = vmatmul.mubr.f32.gmra.mrb[26].mxu0 %v8401_v32 }
  0x8f   : > { %6557 = vmatmul.mubr.f32.gmra.mrb[26].mxu1 %v8401_v32  ;;  %6709 = vmatprep.mubr.f32.mxu0 %v8409_v17 }
  0x90   : > { %6559 = vmatprep.mubr.f32.mxu1 %v8409_v17 }
  0x92   : > { %6710 = vmatmul.mubr.f32.gmra.mrb[28].mxu0 %v8433_v0 }
  0x93   : > { %6560 = vmatmul.mubr.f32.gmra.mrb[28].mxu1 %v8433_v0  ;;  %6712 = vmatprep.mubr.f32.mxu0 %v8442_v4 }
  0x94   : > { %6562 = vmatprep.mubr.f32.mxu1 %v8442_v4 }
  0x96   : > { %6713 = vmatmul.mubr.f32.gmra.mrb[30].mxu0 %v8458_v51 }
  0x97   : > { %6563 = vmatmul.mubr.f32.gmra.mrb[30].mxu1 %v8458_v51  ;;  %6717 = vmatprep.mubr.f32.mxu0 %v7950_v9 }
  0x98   : > { %6567 = vmatprep.mubr.f32.mxu1 %v7970_v19 }
  0x9a   : > { %6718 = vmatmul.mubr.f32.vlgmr.msra.gmra.mrb[0].mxu0 %v7952_v10 }
  0x9b   : > { %6568 = vmatmul.mubr.f32.vlgmr.msra.gmra.mrb[0].mxu1 %v7973_v20  ;;  %6720 = vmatprep.mubr.f32.mxu0 %v7954_v11 }
  0x9c   : > { %6570 = vmatprep.mubr.f32.mxu1 %v7976_v21  ;;  %6766 = vmatpush3.msra.mxu1 %v8532_v57 }
  0x9d   : > { %7066 = vmatpush3.msra.mxu0 %v8535_v58  ;;  %6815 = vmatprep.subr.mxu1 %v8621_v1 }
  0x9e   : > { %6721 = vmatmul.mubr.f32.gmra.mrb[2].mxu0 %v7960_v14  ;;  %7115 = vmatprep.subr.mxu0 %v8624_v61 }
  0x9f   : > { %6571 = vmatmul.mubr.f32.gmra.mrb[2].mxu1 %v7981_v23  ;;  %6723 = vmatprep.mubr.f32.mxu0 %v7978_v22 }
  0xa0   : > { %6573 = vmatprep.mubr.f32.mxu1 %v8003_v30  ;;  %v9519_v30 = vld [vmem:[#allocation23_spill] sm:$0xff] }
  0xa2   : > { %6724 = vmatmul.mubr.f32.gmra.mrb[4].mxu0 %v7983_v24 }
  0xa3   : > { %6574 = vmatmul.mubr.f32.gmra.mrb[4].mxu1 %v8010_v33  ;;  %6726 = vmatprep.mubr.f32.mxu0 %v7985_v25  ;;  %v9520_v33 = vld [vmem:[#allocation26_spill] sm:$0xff] }
  0xa4   : > { %6576 = vmatprep.mubr.f32.mxu1 %v8013_v34  ;;  %v9521_v34 = vld [vmem:[#allocation28_spill] sm:$0xff] }
  0xa6   : > { %6727 = vmatmul.mubr.f32.gmra.mrb[6].mxu0 %v8015_v35 }
  0xa7   : > { %6577 = vmatmul.mubr.f32.gmra.mrb[6].mxu1 %v8069_v55  ;;  %6729 = vmatprep.mubr.f32.mxu0 %v8087_v63  ;;  %v9522_v55 = vld [vmem:[#allocation30_spill] sm:$0xff] }
  0xa8   : > { %6579 = vmatprep.mubr.f32.mxu1 %v9517_v12  ;;  %v9523_v12 = vld [vmem:[#allocation34_spill] sm:$0xff] }
  0xaa   : > { %6730 = vmatmul.mubr.f32.gmra.mrb[8].mxu0 %v8094_v2 }
  0xab   : > { %6580 = vmatmul.mubr.f32.gmra.mrb[8].mxu1 %v9518_v13  ;;  %6732 = vmatprep.mubr.f32.mxu0 %v8103_v6  ;;  %v9524_v13 = vld [vmem:[#allocation37_spill] sm:$0xff] }
  0xac   : > { %6582 = vmatprep.mubr.f32.mxu1 %v9519_v30  ;;  %v9525_v30 = vld [vmem:[#allocation40_spill] sm:$0xff] }
  0xae   : > { %6733 = vmatmul.mubr.f32.gmra.mrb[10].mxu0 %v8113_v16 }
  0xaf   : > { %6583 = vmatmul.mubr.f32.gmra.mrb[10].mxu1 %v9520_v33  ;;  %6735 = vmatprep.mubr.f32.mxu0 %v8127_v31  ;;  %v9526_v33 = vld [vmem:[#allocation44_spill] sm:$0xff] }
  0xb0   : > { %6585 = vmatprep.mubr.f32.mxu1 %v9521_v34  ;;  %v9527_v34 = vld [vmem:[#allocation46_spill] sm:$0xff] }
  0xb2   : > { %6736 = vmatmul.mubr.f32.gmra.mrb[12].mxu0 %v8139_v44 }
  0xb3   : > { %6586 = vmatmul.mubr.f32.gmra.mrb[12].mxu1 %v9522_v55  ;;  %6738 = vmatprep.mubr.f32.mxu0 %v8162_v59  ;;  %v9528_v55 = vld [vmem:[#allocation49_spill] sm:$0xff] }
  0xb4   : > { %6588 = vmatprep.mubr.f32.mxu1 %v9523_v12  ;;  %v9529_v12 = vld [vmem:[#allocation52_spill] sm:$0xff] }
  0xb6   : > { %6739 = vmatmul.mubr.f32.gmra.mrb[14].mxu0 %v8190_v37 }
  0xb7   : > { %6589 = vmatmul.mubr.f32.gmra.mrb[14].mxu1 %v9524_v13  ;;  %6741 = vmatprep.mubr.f32.mxu0 %v8201_v42  ;;  %v9530_v13 = vld [vmem:[#allocation53_spill] sm:$0xff] }
  0xb8   : > { %6591 = vmatprep.mubr.f32.mxu1 %v9525_v30  ;;  %v9531_v30 = vld [vmem:[#allocation54_spill] sm:$0xff] }
  0xba   : > { %6742 = vmatmul.mubr.f32.gmra.mrb[16].mxu0 %v8227_v18 }
  0xbb   : > { %6592 = vmatmul.mubr.f32.gmra.mrb[16].mxu1 %v9526_v33  ;;  %6744 = vmatprep.mubr.f32.mxu0 %v8232_v38  ;;  %v9532_v33 = vld [vmem:[#allocation61_spill] sm:$0xff] }
  0xbc   : > { %6594 = vmatprep.mubr.f32.mxu1 %v9527_v34  ;;  %v9533_v34 = vld [vmem:[#allocation63_spill] sm:$0xff] }
  0xbe   : > { %6745 = vmatmul.mubr.f32.gmra.mrb[18].mxu0 %v8254_v54 }
  0xbf   : > { %6595 = vmatmul.mubr.f32.gmra.mrb[18].mxu1 %v9528_v55  ;;  %6747 = vmatprep.mubr.f32.mxu0 %v8266_v56 }
  0xc0   : > { %6597 = vmatprep.mubr.f32.mxu1 %v9529_v12 }
  0xc2   : > { %6748 = vmatmul.mubr.f32.gmra.mrb[20].mxu0 %v8277_v48 }
  0xc3   : > { %6598 = vmatmul.mubr.f32.gmra.mrb[20].mxu1 %v9530_v13  ;;  %6750 = vmatprep.mubr.f32.mxu0 %v8290_v45 }
  0xc4   : > { %6600 = vmatprep.mubr.f32.mxu1 %v9531_v30 }
  0xc6   : > { %6751 = vmatmul.mubr.f32.gmra.mrb[22].mxu0 %v8315_v41 }
  0xc7   : > { %6601 = vmatmul.mubr.f32.gmra.mrb[22].mxu1 %v9532_v33  ;;  %6753 = vmatprep.mubr.f32.mxu0 %v8329_v52 }
  0xc8   : > { %6603 = vmatprep.mubr.f32.mxu1 %v9533_v34 }
  0xca   : > { %6754 = vmatmul.mubr.f32.gmra.mrb[24].mxu0 %v8366_v40 }
  0xcb   : > { %6604 = vmatmul.mubr.f32.gmra.mrb[24].mxu1 %v8399_v60  ;;  %6756 = vmatprep.mubr.f32.mxu0 %v8373_v29 }
  0xcc   : > { %6606 = vmatprep.mubr.f32.mxu1 %v8407_v15  ;;  %v9534_v15 = vld [vmem:[#allocation12_spill] sm:$0xff] }
  0xce   : > { %6757 = vmatmul.mubr.f32.gmra.mrb[26].mxu0 %v8401_v32 }
  0xcf   : > { %6607 = vmatmul.mubr.f32.gmra.mrb[26].mxu1 %v8431_v62  ;;  %6759 = vmatprep.mubr.f32.mxu0 %v8409_v17  ;;  %v9535_v62 = vld [vmem:[#allocation13_spill] sm:$0xff] }
  0xd0   : > { %6609 = vmatprep.mubr.f32.mxu1 %v8440_v39  ;;  %v9536_v39 = vld [vmem:[#allocation14_spill] sm:$0xff] }
  0xd2   : > { %6760 = vmatmul.mubr.f32.gmra.mrb[28].mxu0 %v8433_v0 }
  0xd3   : > { %6610 = vmatmul.mubr.f32.gmra.mrb[28].mxu1 %v8456_v50  ;;  %6762 = vmatprep.mubr.f32.mxu0 %v8442_v4 }
  0xd4   : > { %6612 = vmatprep.mubr.f32.mxu1 %v8469_v46  ;;  %v9537_v46 = vld [vmem:[#allocation15_spill] sm:$0xff] }
  0xd6   : > { %6763 = vmatmul.mubr.f32.gmra.mrb[30].mxu0 %v8458_v51 }
  0xd7   : > { %6613 = vmatmul.mubr.f32.gmra.mrb[30].mxu1 %v8482_v5  ;;  %7067 = vmatprep.mubr.f32.mxu0 %v9534_v15 }
  0xd8   : > { %6767 = vmatprep.mubr.f32.mxu1 %v9534_v15  ;;  %v9538_v15 = vld [vmem:[#allocation17_spill] sm:$0xff] }
  0xda   : > { %7068 = vmatmul.mubr.f32.vlgmr.msra.gmra.mrb[32].mxu0 %v9535_v62 }
  0xdb   : > { %6768 = vmatmul.mubr.f32.vlgmr.msra.gmra.mrb[32].mxu1 %v9535_v62  ;;  %7070 = vmatprep.mubr.f32.mxu0 %v9536_v39  ;;  %v9539_v62 = vld [vmem:[#allocation18_spill] sm:$0xff] }
  0xdc   : > { %6770 = vmatprep.mubr.f32.mxu1 %v9536_v39  ;;  %6816 = vmatpush3.msra.mxu1 %v8621_v1  ;;  %v9540_v39 = vld [vmem:[#allocation24_spill] sm:$0xff]  ;;  %v9542_v1 = vld [vmem:[#allocation33_spill] sm:$0xff] }
  0xdd   : > { %7116 = vmatpush3.msra.mxu0 %v8624_v61  ;;  %6865 = vmatprep.subr.mxu1 %v8594_v36  ;;  %v9541_v61 = vld [vmem:[#allocation31_spill] sm:$0xff] }
  0xde   : > { %7071 = vmatmul.mubr.f32.gmra.mrb[34].mxu0 %v9537_v46  ;;  %7165 = vmatprep.subr.mxu0 %v8598_v49 }
  0xdf   : > { %6771 = vmatmul.mubr.f32.gmra.mrb[34].mxu1 %v9537_v46  ;;  %7073 = vmatprep.mubr.f32.mxu0 %v9538_v15  ;;  %v9543_v46 = vld [vmem:[#allocation35_spill] sm:$0xff] }
  0xe0   : > { %6773 = vmatprep.mubr.f32.mxu1 %v9538_v15  ;;  %v9544_v15 = vld [vmem:[#allocation38_spill] sm:$0xff] }
  0xe2   : > { %7074 = vmatmul.mubr.f32.gmra.mrb[36].mxu0 %v9539_v62 }
  0xe3   : > { %6774 = vmatmul.mubr.f32.gmra.mrb[36].mxu1 %v9539_v62  ;;  %7076 = vmatprep.mubr.f32.mxu0 %v9540_v39  ;;  %v9545_v62 = vld [vmem:[#allocation41_spill] sm:$0xff] }
  0xe4   : > { %6776 = vmatprep.mubr.f32.mxu1 %v9540_v39  ;;  %v9546_v39 = vld [vmem:[#allocation43_spill] sm:$0xff] }
  0xe6   : > { %7077 = vmatmul.mubr.f32.gmra.mrb[38].mxu0 %v9541_v61 }
  0xe7   : > { %6777 = vmatmul.mubr.f32.gmra.mrb[38].mxu1 %v9541_v61  ;;  %7079 = vmatprep.mubr.f32.mxu0 %v9542_v1  ;;  %v9547_v61 = vld [vmem:[#allocation47_spill] sm:$0xff] }
  0xe8   : > { %6779 = vmatprep.mubr.f32.mxu1 %v9542_v1  ;;  %v9548_v1 = vld [vmem:[#allocation50_spill] sm:$0xff] }
  0xea   : > { %7080 = vmatmul.mubr.f32.gmra.mrb[40].mxu0 %v9543_v46 }
  0xeb   : > { %6780 = vmatmul.mubr.f32.gmra.mrb[40].mxu1 %v9543_v46  ;;  %7082 = vmatprep.mubr.f32.mxu0 %v9544_v15  ;;  %v9549_v46 = vld [vmem:[#allocation55_spill] sm:$0xff] }
  0xec   : > { %6782 = vmatprep.mubr.f32.mxu1 %v9544_v15  ;;  %v9550_v15 = vld [vmem:[#allocation57_spill] sm:$0xff] }
  0xee   : > { %7083 = vmatmul.mubr.f32.gmra.mrb[42].mxu0 %v9545_v62 }
  0xef   : > { %6783 = vmatmul.mubr.f32.gmra.mrb[42].mxu1 %v9545_v62  ;;  %7085 = vmatprep.mubr.f32.mxu0 %v9546_v39  ;;  %v9551_v62 = vld [vmem:[#allocation62_spill] sm:$0xff] }
  0xf0   : > { %6785 = vmatprep.mubr.f32.mxu1 %v9546_v39  ;;  %v9552_v39 = vld [vmem:[#allocation64_spill] sm:$0xff] }
  0xf2   : > { %7086 = vmatmul.mubr.f32.gmra.mrb[44].mxu0 %v9547_v61 }
  0xf3   : > { %6786 = vmatmul.mubr.f32.gmra.mrb[44].mxu1 %v9547_v61  ;;  %7088 = vmatprep.mubr.f32.mxu0 %v9548_v1  ;;  %v9553_v61 = vld [vmem:[#allocation66_spill] sm:$0xff] }
  0xf4   : > { %6788 = vmatprep.mubr.f32.mxu1 %v9548_v1  ;;  %v9554_v1 = vld [vmem:[#allocation68_spill] sm:$0xff] }
  0xf6   : > { %7089 = vmatmul.mubr.f32.gmra.mrb[46].mxu0 %v9549_v46 }
  0xf7   : > { %6789 = vmatmul.mubr.f32.gmra.mrb[46].mxu1 %v9549_v46  ;;  %7091 = vmatprep.mubr.f32.mxu0 %v9550_v15  ;;  %v9555_v46 = vld [vmem:[#allocation70_spill] sm:$0xff] }
  0xf8   : > { %6791 = vmatprep.mubr.f32.mxu1 %v9550_v15  ;;  %v9556_v15 = vld [vmem:[#allocation71_spill] sm:$0xff] }
  0xfa   : > { %7092 = vmatmul.mubr.f32.gmra.mrb[48].mxu0 %v9551_v62 }
  0xfb   : > { %6792 = vmatmul.mubr.f32.gmra.mrb[48].mxu1 %v9551_v62  ;;  %7094 = vmatprep.mubr.f32.mxu0 %v9552_v39  ;;  %v9557_v62 = vld [vmem:[#allocation77_spill] sm:$0xff] }
  0xfc   : > { %6794 = vmatprep.mubr.f32.mxu1 %v9552_v39  ;;  %v9558_v39 = vld [vmem:[#allocation81_spill] sm:$0xff] }
  0xfe   : > { %7095 = vmatmul.mubr.f32.gmra.mrb[50].mxu0 %v9553_v61 }
  0xff   : > { %6795 = vmatmul.mubr.f32.gmra.mrb[50].mxu1 %v9553_v61  ;;  %7097 = vmatprep.mubr.f32.mxu0 %v9554_v1  ;;  %v9567_v61 = vld [vmem:[#allocation28_spill] sm:$0xff] }
 0x100   : > { %6797 = vmatprep.mubr.f32.mxu1 %v9554_v1 }
 0x102   : > { %7098 = vmatmul.mubr.f32.gmra.mrb[52].mxu0 %v9555_v46 }
 0x103   : > { %6798 = vmatmul.mubr.f32.gmra.mrb[52].mxu1 %v9555_v46  ;;  %7100 = vmatprep.mubr.f32.mxu0 %v9556_v15 }
 0x104   : > { %6800 = vmatprep.mubr.f32.mxu1 %v9556_v15 }
 0x106   : > { %7101 = vmatmul.mubr.f32.gmra.mrb[54].mxu0 %v8446_v53 }
 0x107   : > { %6801 = vmatmul.mubr.f32.gmra.mrb[54].mxu1 %v8446_v53  ;;  %7103 = vmatprep.mubr.f32.mxu0 %v9557_v62  ;;  %v9562_v53 = vld [vmem:[#allocation16_spill] sm:$0xff] }
 0x108   : > { %6803 = vmatprep.mubr.f32.mxu1 %v9557_v62 }
 0x10a   : > { %7104 = vmatmul.mubr.f32.gmra.mrb[56].mxu0 %v8474_v7 }
 0x10b   : > { %6804 = vmatmul.mubr.f32.gmra.mrb[56].mxu1 %v8474_v7  ;;  %7106 = vmatprep.mubr.f32.mxu0 %v9558_v39  ;;  %v9565_v7 = vld [vmem:[#allocation23_spill] sm:$0xff] }
 0x10c   : > { %6806 = vmatprep.mubr.f32.mxu1 %v9558_v39  ;;  %v9568_v39 = vld [vmem:[#allocation30_spill] sm:$0xff] }
 0x10e   : > { %7107 = vmatmul.mubr.f32.gmra.mrb[58].mxu0 %v8495_v43 }
 0x10f   : > { %6807 = vmatmul.mubr.f32.gmra.mrb[58].mxu1 %v8495_v43  ;;  %7109 = vmatprep.mubr.f32.mxu0 %v8503_v28 }
 0x110   : > { %6809 = vmatprep.mubr.f32.mxu1 %v8503_v28  ;;  %v9563_v28 = vld [vmem:[#allocation20_spill] sm:$0xff] }
 0x112   : > { %7110 = vmatmul.mubr.f32.gmra.mrb[60].mxu0 %v8510_v26 }
 0x113   : > { %6810 = vmatmul.mubr.f32.gmra.mrb[60].mxu1 %v8510_v26  ;;  %7112 = vmatprep.mubr.f32.mxu0 %v8515_v8 }
 0x114   : > { %6812 = vmatprep.mubr.f32.mxu1 %v8515_v8 }
 0x116   : > { %7113 = vmatmul.mubr.f32.gmra.mrb[62].mxu0 %v8520_v3 }
 0x117   : > { %6813 = vmatmul.mubr.f32.gmra.mrb[62].mxu1 %v8520_v3  ;;  %7117 = vmatprep.mubr.f32.mxu0 %v7950_v9  ;;  %v9566_v3 = vld [vmem:[#allocation26_spill] sm:$0xff] }
 0x118   : > { %6817 = vmatprep.mubr.f32.mxu1 %v7950_v9 }
 0x11a   : > { %7118 = vmatmul.mubr.f32.vlgmr.msra.gmra.mrb[32].mxu0 %v7952_v10 }
 0x11b   : > { %6818 = vmatmul.mubr.f32.vlgmr.msra.gmra.mrb[32].mxu1 %v7952_v10  ;;  %7120 = vmatprep.mubr.f32.mxu0 %v7954_v11 }
 0x11c   : > { %6820 = vmatprep.mubr.f32.mxu1 %v7954_v11  ;;  %6866 = vmatpush3.msra.mxu1 %v8594_v36 }
 0x11d   : > { %7166 = vmatpush3.msra.mxu0 %v8598_v49  ;;  %6915 = vmatprep.subr.mxu1 %v8532_v57 }
 0x11e   : > { %7121 = vmatmul.mubr.f32.gmra.mrb[34].mxu0 %v7960_v14  ;;  %7215 = vmatprep.subr.mxu0 %v8535_v58 }
 0x11f   : > { %6821 = vmatmul.mubr.f32.gmra.mrb[34].mxu1 %v7960_v14  ;;  %7123 = vmatprep.mubr.f32.mxu0 %v7978_v22 }
 0x120   : > { %6823 = vmatprep.mubr.f32.mxu1 %v7978_v22 }
 0x122   : > { %7124 = vmatmul.mubr.f32.gmra.mrb[36].mxu0 %v7983_v24 }
 0x123   : > { %6824 = vmatmul.mubr.f32.gmra.mrb[36].mxu1 %v7983_v24  ;;  %7126 = vmatprep.mubr.f32.mxu0 %v7985_v25 }
 0x124   : > { %6826 = vmatprep.mubr.f32.mxu1 %v7985_v25 }
 0x126   : > { %7127 = vmatmul.mubr.f32.gmra.mrb[38].mxu0 %v8015_v35 }
 0x127   : > { %6827 = vmatmul.mubr.f32.gmra.mrb[38].mxu1 %v8015_v35  ;;  %7129 = vmatprep.mubr.f32.mxu0 %v8087_v63 }
 0x128   : > { %6829 = vmatprep.mubr.f32.mxu1 %v8087_v63 }
 0x12a   : > { %7130 = vmatmul.mubr.f32.gmra.mrb[40].mxu0 %v8094_v2 }
 0x12b   : > { %6830 = vmatmul.mubr.f32.gmra.mrb[40].mxu1 %v8094_v2  ;;  %7132 = vmatprep.mubr.f32.mxu0 %v8103_v6 }
 0x12c   : > { %6832 = vmatprep.mubr.f32.mxu1 %v8103_v6 }
 0x12e   : > { %7133 = vmatmul.mubr.f32.gmra.mrb[42].mxu0 %v8113_v16 }
 0x12f   : > { %6833 = vmatmul.mubr.f32.gmra.mrb[42].mxu1 %v8113_v16  ;;  %7135 = vmatprep.mubr.f32.mxu0 %v8127_v31 }
 0x130   : > { %6835 = vmatprep.mubr.f32.mxu1 %v8127_v31 }
 0x132   : > { %7136 = vmatmul.mubr.f32.gmra.mrb[44].mxu0 %v8139_v44 }
 0x133   : > { %6836 = vmatmul.mubr.f32.gmra.mrb[44].mxu1 %v8139_v44  ;;  %7138 = vmatprep.mubr.f32.mxu0 %v8162_v59 }
 0x134   : > { %6838 = vmatprep.mubr.f32.mxu1 %v8162_v59 }
 0x136   : > { %7139 = vmatmul.mubr.f32.gmra.mrb[46].mxu0 %v8190_v37 }
 0x137   : > { %6839 = vmatmul.mubr.f32.gmra.mrb[46].mxu1 %v8190_v37  ;;  %7141 = vmatprep.mubr.f32.mxu0 %v8201_v42 }
 0x138   : > { %6841 = vmatprep.mubr.f32.mxu1 %v8201_v42 }
 0x13a   : > { %7142 = vmatmul.mubr.f32.gmra.mrb[48].mxu0 %v8227_v18 }
 0x13b   : > { %6842 = vmatmul.mubr.f32.gmra.mrb[48].mxu1 %v8227_v18  ;;  %7144 = vmatprep.mubr.f32.mxu0 %v8232_v38 }
 0x13c   : > { %6844 = vmatprep.mubr.f32.mxu1 %v8232_v38 }
 0x13e   : > { %7145 = vmatmul.mubr.f32.gmra.mrb[50].mxu0 %v8254_v54 }
 0x13f   : > { %6845 = vmatmul.mubr.f32.gmra.mrb[50].mxu1 %v8254_v54  ;;  %7147 = vmatprep.mubr.f32.mxu0 %v8266_v56 }
 0x140   : > { %6847 = vmatprep.mubr.f32.mxu1 %v8266_v56 }
 0x142   : > { %7148 = vmatmul.mubr.f32.gmra.mrb[52].mxu0 %v8277_v48 }
 0x143   : > { %6848 = vmatmul.mubr.f32.gmra.mrb[52].mxu1 %v8277_v48  ;;  %7150 = vmatprep.mubr.f32.mxu0 %v8290_v45 }
 0x144   : > { %6850 = vmatprep.mubr.f32.mxu1 %v8290_v45 }
 0x146   : > { %7151 = vmatmul.mubr.f32.gmra.mrb[54].mxu0 %v8315_v41 }
 0x147   : > { %6851 = vmatmul.mubr.f32.gmra.mrb[54].mxu1 %v8315_v41  ;;  %7153 = vmatprep.mubr.f32.mxu0 %v8329_v52 }
 0x148   : > { %6853 = vmatprep.mubr.f32.mxu1 %v8329_v52 }
 0x14a   : > { %7154 = vmatmul.mubr.f32.gmra.mrb[56].mxu0 %v8366_v40 }
 0x14b   : > { %6854 = vmatmul.mubr.f32.gmra.mrb[56].mxu1 %v8366_v40  ;;  %7156 = vmatprep.mubr.f32.mxu0 %v8373_v29 }
 0x14c   : > { %6856 = vmatprep.mubr.f32.mxu1 %v8373_v29 }
 0x14e   : > { %7157 = vmatmul.mubr.f32.gmra.mrb[58].mxu0 %v8401_v32 }
 0x14f   : > { %6857 = vmatmul.mubr.f32.gmra.mrb[58].mxu1 %v8401_v32  ;;  %7159 = vmatprep.mubr.f32.mxu0 %v8409_v17 }
 0x150   : > { %6859 = vmatprep.mubr.f32.mxu1 %v8409_v17 }
 0x152   : > { %7160 = vmatmul.mubr.f32.gmra.mrb[60].mxu0 %v8433_v0 }
 0x153   : > { %6860 = vmatmul.mubr.f32.gmra.mrb[60].mxu1 %v8433_v0  ;;  %7162 = vmatprep.mubr.f32.mxu0 %v8442_v4 }
 0x154   : > { %6862 = vmatprep.mubr.f32.mxu1 %v8442_v4 }
 0x156   : > { %7163 = vmatmul.mubr.f32.gmra.mrb[62].mxu0 %v8458_v51 }
 0x157   : > { %6863 = vmatmul.mubr.f32.gmra.mrb[62].mxu1 %v8458_v51  ;;  %7167 = vmatprep.mubr.f32.mxu0 %v7970_v19 }
 0x158   : > { %6867 = vmatprep.mubr.f32.mxu1 %v7970_v19  ;;  %v9559_v19 = vld [vmem:[#allocation5_spill] sm:$0xff] }
 0x15a   : > { %7168 = vmatmul.mubr.f32.vlgmr.msra.gmra.mrb[32].mxu0 %v7973_v20 }
 0x15b   : > { %6868 = vmatmul.mubr.f32.vlgmr.msra.gmra.mrb[32].mxu1 %v7973_v20  ;;  %7170 = vmatprep.mubr.f32.mxu0 %v7976_v21  ;;  %v9560_v20 = vld [vmem:[#allocation7_spill] sm:$0xff] }
 0x15c   : > { %6870 = vmatprep.mubr.f32.mxu1 %v7976_v21  ;;  %6916 = vmatpush3.msra.mxu1 %v8532_v57  ;;  %v9561_v21 = vld [vmem:[#allocation8_spill] sm:$0xff] }
 0x15d   : > { %7216 = vmatpush3.msra.mxu0 %v8535_v58  ;;  %6965 = vmatprep.subr.mxu1 %v8604_v27 }
 0x15e   : > { %7171 = vmatmul.mubr.f32.gmra.mrb[34].mxu0 %v7981_v23  ;;  %7265 = vmatprep.subr.mxu0 %v8608_v47 }
 0x15f   : > { %6871 = vmatmul.mubr.f32.gmra.mrb[34].mxu1 %v7981_v23  ;;  %7173 = vmatprep.mubr.f32.mxu0 %v9559_v19  ;;  %v9564_v23 = vld [vmem:[#allocation21_spill] sm:$0xff] }
 0x160   : > { %6873 = vmatprep.mubr.f32.mxu1 %v9559_v19 }
 0x162   : > { %7174 = vmatmul.mubr.f32.gmra.mrb[36].mxu0 %v9560_v20 }
 0x163   : > { %6874 = vmatmul.mubr.f32.gmra.mrb[36].mxu1 %v9560_v20  ;;  %7176 = vmatprep.mubr.f32.mxu0 %v9561_v21 }
 0x164   : > { %6876 = vmatprep.mubr.f32.mxu1 %v9561_v21  ;;  %v9569_v21 = vld [vmem:[#allocation34_spill] sm:$0xff] }
 0x166   : > { %7177 = vmatmul.mubr.f32.gmra.mrb[38].mxu0 %v9562_v53 }
 0x167   : > { %6877 = vmatmul.mubr.f32.gmra.mrb[38].mxu1 %v9562_v53  ;;  %7179 = vmatprep.mubr.f32.mxu0 %v9563_v28 }
 0x168   : > { %6879 = vmatprep.mubr.f32.mxu1 %v9563_v28 }
 0x16a   : > { %7180 = vmatmul.mubr.f32.gmra.mrb[40].mxu0 %v9564_v23 }
 0x16b   : > { %6880 = vmatmul.mubr.f32.gmra.mrb[40].mxu1 %v9564_v23  ;;  %7182 = vmatprep.mubr.f32.mxu0 %v9565_v7 }
 0x16c   : > { %6882 = vmatprep.mubr.f32.mxu1 %v9565_v7 }
 0x16d   : > { %v6719_v8 = vpop.f32.mrb[0].mxu0 }
 0x16e   : > { %v6569_v43 = vpop.f32.mrb[0].mxu1  ;;  %v1894_v26 = vpop.f32.mrb[1].mxu0  ;;  %7183 = vmatmul.mubr.f32.gmra.mrb[42].mxu0 %v9566_v3 }
 0x16f   : > { %v8854_v36 = vadd.f32 %v6719_v8, %v6569_v43  ;;  %v1023_v49 = vpop.f32.mrb[1].mxu1  ;;  %6883 = vmatmul.mubr.f32.gmra.mrb[42].mxu1 %v9566_v3  ;;  %7185 = vmatprep.mubr.f32.mxu0 %v9567_v61  ;;  %v9570_v8 = vld [vmem:[#allocation37_spill] sm:$0xff]  ;;  %v9571_v3 = vld [vmem:[#allocation40_spill] sm:$0xff] }
 0x170   : > { %v8858_v1 = vadd.f32 %v1894_v26, %v1023_v49  ;;  %6885 = vmatprep.mubr.f32.mxu1 %v9567_v61 }
 0x171   : > { %v6722_v46 = vpop.f32.mrb[2].mxu0 }
 0x172   : > { %v6572_v15 = vpop.f32.mrb[2].mxu1  ;;  %v1906_v62 = vpop.f32.mrb[3].mxu0  ;;  %7186 = vmatmul.mubr.f32.gmra.mrb[44].mxu0 %v9568_v39 }
 0x173   : > { %v8862_v19 = vadd.f32 %v6722_v46, %v6572_v15  ;;  %v1037_v20 = vpop.f32.mrb[3].mxu1  ;;  %6886 = vmatmul.mubr.f32.gmra.mrb[44].mxu1 %v9568_v39  ;;  %7188 = vmatprep.mubr.f32.mxu0 %v9569_v21 }
 0x174   : > { %v8866_v53 = vadd.f32 %v1906_v62, %v1037_v20  ;;  %6888 = vmatprep.mubr.f32.mxu1 %v9569_v21  ;;  %v9572_v62 = vld [vmem:[#allocation44_spill] sm:$0xff]  ;;  %v9573_v21 = vld [vmem:[#allocation46_spill] sm:$0xff] }
 0x175   : > { %v6725_v28 = vpop.f32.mrb[4].mxu0 }
 0x176   : > { %v6575_v23 = vpop.f32.mrb[4].mxu1  ;;  %v1918_v7 = vpop.f32.mrb[5].mxu0  ;;  %7189 = vmatmul.mubr.f32.gmra.mrb[46].mxu0 %v9570_v8 }
 0x177   : > { %v8870_v43 = vadd.f32 %v6725_v28, %v6575_v23  ;;  %v1051_v26 = vpop.f32.mrb[5].mxu1  ;;  %6889 = vmatmul.mubr.f32.gmra.mrb[46].mxu1 %v9570_v8  ;;  %7191 = vmatprep.mubr.f32.mxu0 %v9571_v3 }
 0x178   : > { %v8874_v49 = vadd.f32 %v1918_v7, %v1051_v26  ;;  %6891 = vmatprep.mubr.f32.mxu1 %v9571_v3 }
 0x179   : > { %v6728_v61 = vpop.f32.mrb[6].mxu0 }
 0x17a   : > { %v6578_v46 = vpop.f32.mrb[6].mxu1  ;;  %v1930_v15 = vpop.f32.mrb[7].mxu0  ;;  %7192 = vmatmul.mubr.f32.gmra.mrb[48].mxu0 %v9572_v62 }
 0x17b   : > { %v8878_v39 = vadd.f32 %v6728_v61, %v6578_v46  ;;  %v1065_v20 = vpop.f32.mrb[7].mxu1  ;;  %6892 = vmatmul.mubr.f32.gmra.mrb[48].mxu1 %v9572_v62  ;;  %7194 = vmatprep.mubr.f32.mxu0 %v9573_v21 }
 0x17c   : > { %v8882_v28 = vadd.f32 %v1930_v15, %v1065_v20  ;;  %6894 = vmatprep.mubr.f32.mxu1 %v9573_v21 }
 0x17d   : > { %v6731_v23 = vpop.f32.mrb[8].mxu0 }
 0x17e   : > { %v6581_v7 = vpop.f32.mrb[8].mxu1  ;;  %v1942_v8 = vpop.f32.mrb[9].mxu0  ;;  %7195 = vmatmul.mubr.f32.gmra.mrb[50].mxu0 %v9528_v55 }
 0x17f   : > { %v8886_v26 = vadd.f32 %v6731_v23, %v6581_v7  ;;  %v1079_v3 = vpop.f32.mrb[9].mxu1  ;;  %6895 = vmatmul.mubr.f32.gmra.mrb[50].mxu1 %v9528_v55  ;;  %7197 = vmatprep.mubr.f32.mxu0 %v9529_v12 }
 0x180   : > { %v8890_v61 = vadd.f32 %v1942_v8, %v1079_v3  ;;  %6897 = vmatprep.mubr.f32.mxu1 %v9529_v12 }
 0x181   : > { %v6734_v46 = vpop.f32.mrb[10].mxu0 }
 0x182   : > { %v6584_v15 = vpop.f32.mrb[10].mxu1  ;;  %v1954_v62 = vpop.f32.mrb[11].mxu0  ;;  %7198 = vmatmul.mubr.f32.gmra.mrb[52].mxu0 %v9530_v13 }
 0x183   : > { %v8894_v20 = vadd.f32 %v6734_v46, %v6584_v15  ;;  %v1093_v21 = vpop.f32.mrb[11].mxu1  ;;  %6898 = vmatmul.mubr.f32.gmra.mrb[52].mxu1 %v9530_v13  ;;  %7200 = vmatprep.mubr.f32.mxu0 %v9531_v30 }
 0x184   : > { %v8898_v23 = vadd.f32 %v1954_v62, %v1093_v21  ;;  %6900 = vmatprep.mubr.f32.mxu1 %v9531_v30 }
 0x185   : > { %v6737_v55 = vpop.f32.mrb[12].mxu0 }
 0x186   : > { %v6587_v7 = vpop.f32.mrb[12].mxu1  ;;  %v1966_v8 = vpop.f32.mrb[13].mxu0  ;;  %7201 = vmatmul.mubr.f32.gmra.mrb[54].mxu0 %v9532_v33 }
 0x187   : > { %v8902_v12 = vadd.f32 %v6737_v55, %v6587_v7  ;;  %v1107_v3 = vpop.f32.mrb[13].mxu1  ;;  %6901 = vmatmul.mubr.f32.gmra.mrb[54].mxu1 %v9532_v33  ;;  %7203 = vmatprep.mubr.f32.mxu0 %v9533_v34  ;;  %v9576_v55 = vld [vmem:[#allocation69_spill] sm:$0xff] }
 0x188   : > { %v8906_v46 = vadd.f32 %v1966_v8, %v1107_v3  ;;  %6903 = vmatprep.mubr.f32.mxu1 %v9533_v34  ;;  %v9578_v34 = vld [vmem:[#allocation73_spill] sm:$0xff] }
 0x189   : > { %9574 = vst [vmem:[#allocation49_spill] sm:$0xff] %v8902_v12  ;;  %v6740_v13 = vpop.f32.mrb[14].mxu0 }
 0x18a   : > { %9575 = vst [vmem:[#allocation52_spill] sm:$0xff] %v8906_v46  ;;  %v6590_v15 = vpop.f32.mrb[14].mxu1  ;;  %v1978_v62 = vpop.f32.mrb[15].mxu0  ;;  %7204 = vmatmul.mubr.f32.gmra.mrb[56].mxu0 %v8399_v60 }
 0x18b   : > { %v8910_v30 = vadd.f32 %v6740_v13, %v6590_v15  ;;  %v1121_v21 = vpop.f32.mrb[15].mxu1  ;;  %6904 = vmatmul.mubr.f32.gmra.mrb[56].mxu1 %v8399_v60  ;;  %7206 = vmatprep.mubr.f32.mxu0 %v9576_v55  ;;  %v9579_v13 = vld [vmem:[#allocation75_spill] sm:$0xff] }
 0x18c   : > { %v8914_v7 = vadd.f32 %v1978_v62, %v1121_v21  ;;  %6906 = vmatprep.mubr.f32.mxu1 %v9576_v55 }
 0x18d   : > { %v6743_v33 = vpop.f32.mrb[16].mxu0 }
 0x18e   : > { %9577 = vst [vmem:[#allocation53_spill] sm:$0xff] %v8914_v7  ;;  %v6593_v8 = vpop.f32.mrb[16].mxu1  ;;  %v1990_v3 = vpop.f32.mrb[17].mxu0  ;;  %7207 = vmatmul.mubr.f32.gmra.mrb[58].mxu0 %v9578_v34 }
 0x18f   : > { %v8918_v46 = vadd.f32 %v6743_v33, %v6593_v8  ;;  %v1135_v12 = vpop.f32.mrb[17].mxu1  ;;  %6907 = vmatmul.mubr.f32.gmra.mrb[58].mxu1 %v9578_v34  ;;  %7209 = vmatprep.mubr.f32.mxu0 %v9579_v13  ;;  %v9582_v33 = vld [vmem:[#allocation79_spill] sm:$0xff] }
 0x190   : > { %v8922_v15 = vadd.f32 %v1990_v3, %v1135_v12  ;;  %6909 = vmatprep.mubr.f32.mxu1 %v9579_v13 }
 0x191   : > { %v6746_v60 = vpop.f32.mrb[18].mxu0 }
 0x192   : > { %9580 = vst [vmem:[#allocation54_spill] sm:$0xff] %v8922_v15  ;;  %v6596_v62 = vpop.f32.mrb[18].mxu1  ;;  %v2002_v21 = vpop.f32.mrb[19].mxu0  ;;  %7210 = vmatmul.mubr.f32.gmra.mrb[60].mxu0 %v8456_v50 }
 0x193   : > { %v8926_v55 = vadd.f32 %v6746_v60, %v6596_v62  ;;  %v1149_v7 = vpop.f32.mrb[19].mxu1  ;;  %6910 = vmatmul.mubr.f32.gmra.mrb[60].mxu1 %v8456_v50  ;;  %7212 = vmatprep.mubr.f32.mxu0 %v9582_v33  ;;  %v9584_v60 = vld [vmem:[#allocation2_spill] sm:$0xff] }
 0x194   : > { %v8930_v8 = vadd.f32 %v2002_v21, %v1149_v7  ;;  %6912 = vmatprep.mubr.f32.mxu1 %v9582_v33  ;;  %v9585_v33 = vld [vmem:[#allocation3_spill] sm:$0xff] }
 0x195   : > { %9581 = vst [vmem:[#allocation61_spill] sm:$0xff] %v8926_v55  ;;  %v6749_v12 = vpop.f32.mrb[20].mxu0 }
 0x196   : > { %9583 = vst [vmem:[#allocation63_spill] sm:$0xff] %v8930_v8  ;;  %v6599_v3 = vpop.f32.mrb[20].mxu1  ;;  %v2014_v34 = vpop.f32.mrb[21].mxu0  ;;  %7213 = vmatmul.mubr.f32.gmra.mrb[62].mxu0 %v8482_v5 }
 0x197   : > { %v8934_v13 = vadd.f32 %v6749_v12, %v6599_v3  ;;  %v1163_v15 = vpop.f32.mrb[21].mxu1  ;;  %6913 = vmatmul.mubr.f32.gmra.mrb[62].mxu1 %v8482_v5  ;;  %7217 = vmatprep.mubr.f32.mxu0 %v9584_v60  ;;  %v9587_v12 = vld [vmem:[#allocation4_spill] sm:$0xff] }
 0x198   : > { %v8938_v62 = vadd.f32 %v2014_v34, %v1163_v15  ;;  %6917 = vmatprep.mubr.f32.mxu1 %v9584_v60  ;;  %v9589_v60 = vld [vmem:[#allocation6_spill] sm:$0xff] }
 0x199   : > { %v6752_v50 = vpop.f32.mrb[22].mxu0 }
 0x19a   : > { %v6602_v7 = vpop.f32.mrb[22].mxu1  ;;  %v2026_v21 = vpop.f32.mrb[23].mxu0  ;;  %7218 = vmatmul.mubr.f32.vlgmr.msra.gmra.mrb[32].mxu0 %v9585_v33 }
 0x19b   : > { %v8942_v8 = vadd.f32 %v6752_v50, %v6602_v7  ;;  %v1177_v55 = vpop.f32.mrb[23].mxu1  ;;  %6918 = vmatmul.mubr.f32.vlgmr.msra.gmra.mrb[32].mxu1 %v9585_v33  ;;  %7220 = vmatprep.mubr.f32.mxu0 %v9587_v12 }
 0x19c   : > { %v8946_v3 = vadd.f32 %v2026_v21, %v1177_v55  ;;  %6920 = vmatprep.mubr.f32.mxu1 %v9587_v12  ;;  %6966 = vmatpush3.msra.mxu1 %v8604_v27  ;;  %v9591_v55 = vld [vmem:[#allocation9_spill] sm:$0xff]  ;;  %v9593_v12 = vld [vmem:[#allocation10_spill] sm:$0xff] }
 0x19d   : > { %9586 = vst [vmem:[#allocation12_spill] sm:$0xff] %v8942_v8  ;;  %v6755_v5 = vpop.f32.mrb[24].mxu0  ;;  %7266 = vmatpush3.msra.mxu0 %v8608_v47  ;;  %7015 = vmatprep.subr.mxu1 %v8532_v57 }
 0x19e   : > { %9588 = vst [vmem:[#allocation13_spill] sm:$0xff] %v8946_v3  ;;  %v6605_v15 = vpop.f32.mrb[24].mxu1  ;;  %v2038_v34 = vpop.f32.mrb[25].mxu0  ;;  %7221 = vmatmul.mubr.f32.gmra.mrb[34].mxu0 %v9589_v60  ;;  %7315 = vmatprep.subr.mxu0 %v8535_v58 }
 0x19f   : > { %v8954_v50 = vadd.f32 %v6755_v5, %v6605_v15  ;;  %v1191_v7 = vpop.f32.mrb[25].mxu1  ;;  %6921 = vmatmul.mubr.f32.gmra.mrb[34].mxu1 %v9589_v60  ;;  %7223 = vmatprep.mubr.f32.mxu0 %v9591_v55  ;;  %v9595_v5 = vld [vmem:[#allocation11_spill] sm:$0xff] }
 0x1a0   : > { %v8958_v21 = vadd.f32 %v2038_v34, %v1191_v7  ;;  %6923 = vmatprep.mubr.f32.mxu1 %v9591_v55  ;;  %v9597_v55 = vld [vmem:[#allocation19_spill] sm:$0xff] }
 0x1a1   : > { %9590 = vst [vmem:[#allocation14_spill] sm:$0xff] %v8954_v50  ;;  %v6758_v47 = vpop.f32.mrb[26].mxu0 }
 0x1a2   : > { %9592 = vst [vmem:[#allocation15_spill] sm:$0xff] %v8958_v21  ;;  %v6608_v27 = vpop.f32.mrb[26].mxu1  ;;  %v2050_v33 = vpop.f32.mrb[27].mxu0  ;;  %7224 = vmatmul.mubr.f32.gmra.mrb[36].mxu0 %v9593_v12 }
 0x1a3   : > { %v8962_v3 = vadd.f32 %v6758_v47, %v6608_v27  ;;  %v1205_v8 = vpop.f32.mrb[27].mxu1  ;;  %6924 = vmatmul.mubr.f32.gmra.mrb[36].mxu1 %v9593_v12  ;;  %7226 = vmatprep.mubr.f32.mxu0 %v9595_v5  ;;  %v9598_v47 = vld [vmem:[#allocation22_spill] sm:$0xff] }
 0x1a4   : > { %v8966_v15 = vadd.f32 %v2050_v33, %v1205_v8  ;;  %6926 = vmatprep.mubr.f32.mxu1 %v9595_v5  ;;  %v9599_v5 = vld [vmem:[#allocation25_spill] sm:$0xff] }
 0x1a5   : > { %9594 = vst [vmem:[#allocation17_spill] sm:$0xff] %v8962_v3  ;;  %v6761_v34 = vpop.f32.mrb[28].mxu0 }
 0x1a6   : > { %9596 = vst [vmem:[#allocation18_spill] sm:$0xff] %v8966_v15  ;;  %v6611_v60 = vpop.f32.mrb[28].mxu1  ;;  %v2062_v7 = vpop.f32.mrb[29].mxu0  ;;  %7227 = vmatmul.mubr.f32.gmra.mrb[38].mxu0 %v9597_v55 }
 0x1a7   : > { %v8970_v21 = vadd.f32 %v6761_v34, %v6611_v60  ;;  %v1219_v50 = vpop.f32.mrb[29].mxu1  ;;  %6927 = vmatmul.mubr.f32.gmra.mrb[38].mxu1 %v9597_v55  ;;  %7229 = vmatprep.mubr.f32.mxu0 %v9598_v47  ;;  %v9600_v34 = vld [vmem:[#allocation27_spill] sm:$0xff]  ;;  %v9603_v55 = vld [vmem:[#allocation36_spill] sm:$0xff] }
 0x1a8   : > { %v8974_v27 = vadd.f32 %v2062_v7, %v1219_v50  ;;  %6929 = vmatprep.mubr.f32.mxu1 %v9598_v47  ;;  %v9601_v50 = vld [vmem:[#allocation29_spill] sm:$0xff]  ;;  %v9602_v7 = vld [vmem:[#allocation32_spill] sm:$0xff]  ;;  %v9604_v47 = vld [vmem:[#allocation39_spill] sm:$0xff] }
 0x1a9   : > { %v6764_v8 = vpop.f32.mrb[30].mxu0 }
 0x1aa   : > { %v6614_v33 = vpop.f32.mrb[30].mxu1  ;;  %v2074_v12 = vpop.f32.mrb[31].mxu0  ;;  %7230 = vmatmul.mubr.f32.gmra.mrb[40].mxu0 %v9599_v5 }
 0x1ab   : > { %v8978_v15 = vadd.f32 %v6764_v8, %v6614_v33  ;;  %v1233_v3 = vpop.f32.mrb[31].mxu1  ;;  %6930 = vmatmul.mubr.f32.gmra.mrb[40].mxu1 %v9599_v5  ;;  %7232 = vmatprep.mubr.f32.mxu0 %v9600_v34  ;;  %v9606_v8 = vld [vmem:[#allocation45_spill] sm:$0xff]  ;;  %v9607_v33 = vld [vmem:[#allocation48_spill] sm:$0xff] }
 0x1ac   : > { %v8982_v60 = vadd.f32 %v2074_v12, %v1233_v3  ;;  %6932 = vmatprep.mubr.f32.mxu1 %v9600_v34  ;;  %v9605_v3 = vld [vmem:[#allocation42_spill] sm:$0xff]  ;;  %v9608_v12 = vld [vmem:[#allocation51_spill] sm:$0xff]  ;;  %v9609_v5 = vld [vmem:[#allocation56_spill] sm:$0xff] }
 0x1ad   : > { %v9610_v34 = vld [vmem:[#allocation58_spill] sm:$0xff] }
 0x1ae   : > { %7233 = vmatmul.mubr.f32.gmra.mrb[42].mxu0 %v9601_v50 }
 0x1af   : > { %6933 = vmatmul.mubr.f32.gmra.mrb[42].mxu1 %v9601_v50  ;;  %7235 = vmatprep.mubr.f32.mxu0 %v9602_v7  ;;  %v9611_v50 = vld [vmem:[#allocation59_spill] sm:$0xff] }
 0x1b0   : > { %6935 = vmatprep.mubr.f32.mxu1 %v9602_v7  ;;  %v9612_v7 = vld [vmem:[#allocation60_spill] sm:$0xff] }
 0x1b2   : > { %7236 = vmatmul.mubr.f32.gmra.mrb[44].mxu0 %v9603_v55 }
 0x1b3   : > { %6936 = vmatmul.mubr.f32.gmra.mrb[44].mxu1 %v9603_v55  ;;  %7238 = vmatprep.mubr.f32.mxu0 %v9604_v47  ;;  %v9613_v55 = vld [vmem:[#allocation65_spill] sm:$0xff] }
 0x1b4   : > { %6938 = vmatprep.mubr.f32.mxu1 %v9604_v47  ;;  %v9614_v47 = vld [vmem:[#allocation67_spill] sm:$0xff] }
 0x1b6   : > { %7239 = vmatmul.mubr.f32.gmra.mrb[46].mxu0 %v9605_v3 }
 0x1b7   : > { %6939 = vmatmul.mubr.f32.gmra.mrb[46].mxu1 %v9605_v3  ;;  %7241 = vmatprep.mubr.f32.mxu0 %v9606_v8  ;;  %v9615_v3 = vld [vmem:[#allocation72_spill] sm:$0xff] }
 0x1b8   : > { %6941 = vmatprep.mubr.f32.mxu1 %v9606_v8  ;;  %v9616_v8 = vld [vmem:[#allocation74_spill] sm:$0xff] }
 0x1ba   : > { %7242 = vmatmul.mubr.f32.gmra.mrb[48].mxu0 %v9607_v33 }
 0x1bb   : > { %6942 = vmatmul.mubr.f32.gmra.mrb[48].mxu1 %v9607_v33  ;;  %7244 = vmatprep.mubr.f32.mxu0 %v9608_v12  ;;  %v9617_v33 = vld [vmem:[#allocation76_spill] sm:$0xff] }
 0x1bc   : > { %6944 = vmatprep.mubr.f32.mxu1 %v9608_v12  ;;  %v9618_v12 = vld [vmem:[#allocation78_spill] sm:$0xff] }
 0x1be   : > { %7245 = vmatmul.mubr.f32.gmra.mrb[50].mxu0 %v9609_v5 }
 0x1bf   : > { %6945 = vmatmul.mubr.f32.gmra.mrb[50].mxu1 %v9609_v5  ;;  %7247 = vmatprep.mubr.f32.mxu0 %v9610_v34  ;;  %v9619_v5 = vld [vmem:[#allocation80_spill] sm:$0xff] }
 0x1c0   : > { %6947 = vmatprep.mubr.f32.mxu1 %v9610_v34  ;;  %v9620_v34 = vld [vmem:[#allocation82_spill] sm:$0xff] }
 0x1c2   : > { %7248 = vmatmul.mubr.f32.gmra.mrb[52].mxu0 %v9611_v50 }
 0x1c3   : > { %6948 = vmatmul.mubr.f32.gmra.mrb[52].mxu1 %v9611_v50  ;;  %7250 = vmatprep.mubr.f32.mxu0 %v9612_v7  ;;  %v9621_v50 = vld [vmem:[#allocation83_spill] sm:$0xff] }
 0x1c4   : > { %6950 = vmatprep.mubr.f32.mxu1 %v9612_v7 }
 0x1c6   : > { %7251 = vmatmul.mubr.f32.gmra.mrb[54].mxu0 %v9613_v55 }
 0x1c7   : > { %6951 = vmatmul.mubr.f32.gmra.mrb[54].mxu1 %v9613_v55  ;;  %7253 = vmatprep.mubr.f32.mxu0 %v9614_v47 }
 0x1c8   : > { %6953 = vmatprep.mubr.f32.mxu1 %v9614_v47 }
 0x1ca   : > { %7254 = vmatmul.mubr.f32.gmra.mrb[56].mxu0 %v9615_v3 }
 0x1cb   : > { %6954 = vmatmul.mubr.f32.gmra.mrb[56].mxu1 %v9615_v3  ;;  %7256 = vmatprep.mubr.f32.mxu0 %v9616_v8 }
 0x1cc   : > { %6956 = vmatprep.mubr.f32.mxu1 %v9616_v8 }
 0x1ce   : > { %7257 = vmatmul.mubr.f32.gmra.mrb[58].mxu0 %v9617_v33 }
 0x1cf   : > { %6957 = vmatmul.mubr.f32.gmra.mrb[58].mxu1 %v9617_v33  ;;  %7259 = vmatprep.mubr.f32.mxu0 %v9618_v12 }
 0x1d0   : > { %6959 = vmatprep.mubr.f32.mxu1 %v9618_v12 }
 0x1d2   : > { %7260 = vmatmul.mubr.f32.gmra.mrb[60].mxu0 %v9619_v5 }
 0x1d3   : > { %6960 = vmatmul.mubr.f32.gmra.mrb[60].mxu1 %v9619_v5  ;;  %7262 = vmatprep.mubr.f32.mxu0 %v9620_v34 }
 0x1d4   : > { %6962 = vmatprep.mubr.f32.mxu1 %v9620_v34 }
 0x1d6   : > { %7263 = vmatmul.mubr.f32.gmra.mrb[62].mxu0 %v9621_v50 }
 0x1d7   : > { %6963 = vmatmul.mubr.f32.gmra.mrb[62].mxu1 %v9621_v50  ;;  %7267 = vmatprep.mubr.f32.mxu0 %v7950_v9 }
 0x1d8   : > { %6967 = vmatprep.mubr.f32.mxu1 %v7950_v9 }
 0x1da   : > { %7268 = vmatmul.mubr.f32.vlgmr.msra.gmra.mrb[32].mxu0 %v7952_v10 }
 0x1db   : > { %6968 = vmatmul.mubr.f32.vlgmr.msra.gmra.mrb[32].mxu1 %v7952_v10  ;;  %7270 = vmatprep.mubr.f32.mxu0 %v7954_v11 }
 0x1dc   : > { %6970 = vmatprep.mubr.f32.mxu1 %v7954_v11  ;;  %7016 = vmatpush3.msra.mxu1 %v8532_v57 }
 0x1dd   : > { %7316 = vmatpush3.msra.mxu0 %v8535_v58 }
 0x1de   : > { %7271 = vmatmul.mubr.f32.gmra.mrb[34].mxu0 %v7960_v14 }
 0x1df   : > { %6971 = vmatmul.mubr.f32.gmra.mrb[34].mxu1 %v7960_v14  ;;  %7273 = vmatprep.mubr.f32.mxu0 %v7978_v22 }
 0x1e0   : > { %6973 = vmatprep.mubr.f32.mxu1 %v7978_v22 }
 0x1e2   : > { %7274 = vmatmul.mubr.f32.gmra.mrb[36].mxu0 %v7983_v24 }
 0x1e3   : > { %6974 = vmatmul.mubr.f32.gmra.mrb[36].mxu1 %v7983_v24  ;;  %7276 = vmatprep.mubr.f32.mxu0 %v7985_v25 }
 0x1e4   : > { %6976 = vmatprep.mubr.f32.mxu1 %v7985_v25 }
 0x1e6   : > { %7277 = vmatmul.mubr.f32.gmra.mrb[38].mxu0 %v8015_v35 }
 0x1e7   : > { %6977 = vmatmul.mubr.f32.gmra.mrb[38].mxu1 %v8015_v35  ;;  %7279 = vmatprep.mubr.f32.mxu0 %v8087_v63 }
 0x1e8   : > { %6979 = vmatprep.mubr.f32.mxu1 %v8087_v63 }
 0x1ea   : > { %7280 = vmatmul.mubr.f32.gmra.mrb[40].mxu0 %v8094_v2 }
 0x1eb   : > { %6980 = vmatmul.mubr.f32.gmra.mrb[40].mxu1 %v8094_v2  ;;  %7282 = vmatprep.mubr.f32.mxu0 %v8103_v6 }
 0x1ec   : > { %6982 = vmatprep.mubr.f32.mxu1 %v8103_v6 }
 0x1ee   : > { %7283 = vmatmul.mubr.f32.gmra.mrb[42].mxu0 %v8113_v16 }
 0x1ef   : > { %6983 = vmatmul.mubr.f32.gmra.mrb[42].mxu1 %v8113_v16  ;;  %7285 = vmatprep.mubr.f32.mxu0 %v8127_v31 }
 0x1f0   : > { %6985 = vmatprep.mubr.f32.mxu1 %v8127_v31 }
 0x1f2   : > { %7286 = vmatmul.mubr.f32.gmra.mrb[44].mxu0 %v8139_v44 }
 0x1f3   : > { %6986 = vmatmul.mubr.f32.gmra.mrb[44].mxu1 %v8139_v44  ;;  %7288 = vmatprep.mubr.f32.mxu0 %v8162_v59 }
 0x1f4   : > { %6988 = vmatprep.mubr.f32.mxu1 %v8162_v59 }
 0x1f6   : > { %7289 = vmatmul.mubr.f32.gmra.mrb[46].mxu0 %v8190_v37 }
 0x1f7   : > { %6989 = vmatmul.mubr.f32.gmra.mrb[46].mxu1 %v8190_v37  ;;  %7291 = vmatprep.mubr.f32.mxu0 %v8201_v42 }
 0x1f8   : > { %6991 = vmatprep.mubr.f32.mxu1 %v8201_v42 }
 0x1fa   : > { %7292 = vmatmul.mubr.f32.gmra.mrb[48].mxu0 %v8227_v18 }
 0x1fb   : > { %6992 = vmatmul.mubr.f32.gmra.mrb[48].mxu1 %v8227_v18  ;;  %7294 = vmatprep.mubr.f32.mxu0 %v8232_v38 }
 0x1fc   : > { %6994 = vmatprep.mubr.f32.mxu1 %v8232_v38 }
 0x1fe   : > { %7295 = vmatmul.mubr.f32.gmra.mrb[50].mxu0 %v8254_v54 }
 0x1ff   : > { %6995 = vmatmul.mubr.f32.gmra.mrb[50].mxu1 %v8254_v54  ;;  %7297 = vmatprep.mubr.f32.mxu0 %v8266_v56 }
 0x200   : > { %6997 = vmatprep.mubr.f32.mxu1 %v8266_v56 }
 0x202   : > { %7298 = vmatmul.mubr.f32.gmra.mrb[52].mxu0 %v8277_v48 }
 0x203   : > { %6998 = vmatmul.mubr.f32.gmra.mrb[52].mxu1 %v8277_v48  ;;  %7300 = vmatprep.mubr.f32.mxu0 %v8290_v45 }
 0x204   : > { %7000 = vmatprep.mubr.f32.mxu1 %v8290_v45 }
 0x206   : > { %7301 = vmatmul.mubr.f32.gmra.mrb[54].mxu0 %v8315_v41 }
 0x207   : > { %7001 = vmatmul.mubr.f32.gmra.mrb[54].mxu1 %v8315_v41  ;;  %7303 = vmatprep.mubr.f32.mxu0 %v8329_v52 }
 0x208   : > { %7003 = vmatprep.mubr.f32.mxu1 %v8329_v52 }
 0x20a   : > { %7304 = vmatmul.mubr.f32.gmra.mrb[56].mxu0 %v8366_v40 }
 0x20b   : > { %7004 = vmatmul.mubr.f32.gmra.mrb[56].mxu1 %v8366_v40  ;;  %7306 = vmatprep.mubr.f32.mxu0 %v8373_v29 }
 0x20c   : > { %7006 = vmatprep.mubr.f32.mxu1 %v8373_v29 }
 0x20e   : > { %7307 = vmatmul.mubr.f32.gmra.mrb[58].mxu0 %v8401_v32 }
 0x20f   : > { %7007 = vmatmul.mubr.f32.gmra.mrb[58].mxu1 %v8401_v32  ;;  %7309 = vmatprep.mubr.f32.mxu0 %v8409_v17 }
 0x210   : > { %7009 = vmatprep.mubr.f32.mxu1 %v8409_v17 }
 0x212   : > { %7310 = vmatmul.mubr.f32.gmra.mrb[60].mxu0 %v8433_v0 }
 0x213   : > { %7010 = vmatmul.mubr.f32.gmra.mrb[60].mxu1 %v8433_v0  ;;  %7312 = vmatprep.mubr.f32.mxu0 %v8442_v4 }
 0x214   : > { %7012 = vmatprep.mubr.f32.mxu1 %v8442_v4 }
 0x216   : > { %7313 = vmatmul.mubr.f32.gmra.mrb[62].mxu0 %v8458_v51 }
 0x217   : > { %7013 = vmatmul.mubr.f32.gmra.mrb[62].mxu1 %v8458_v51  ;;  %7317 = vmatprep.mubr.f32.mxu0 %v7950_v9 }
 0x218   : > { %7017 = vmatprep.mubr.f32.mxu1 %v7950_v9 }
 0x21a   : > { %7318 = vmatmul.mubr.f32.vlgmr.msra.gmra.mrb[32].mxu0 %v7952_v10 }
 0x21b   : > { %7018 = vmatmul.mubr.f32.vlgmr.msra.gmra.mrb[32].mxu1 %v7952_v10  ;;  %7320 = vmatprep.mubr.f32.mxu0 %v7954_v11 }
 0x21c   : > { %7020 = vmatprep.mubr.f32.mxu1 %v7954_v11 }
 0x21e   : > { %7321 = vmatmul.mubr.f32.gmra.mrb[34].mxu0 %v7960_v14 }
 0x21f   : > { %7021 = vmatmul.mubr.f32.gmra.mrb[34].mxu1 %v7960_v14  ;;  %7323 = vmatprep.mubr.f32.mxu0 %v7978_v22 }
 0x220   : > { %7023 = vmatprep.mubr.f32.mxu1 %v7978_v22 }
 0x222   : > { %7324 = vmatmul.mubr.f32.gmra.mrb[36].mxu0 %v7983_v24 }
 0x223   : > { %7024 = vmatmul.mubr.f32.gmra.mrb[36].mxu1 %v7983_v24  ;;  %7326 = vmatprep.mubr.f32.mxu0 %v7985_v25 }
 0x224   : > { %7026 = vmatprep.mubr.f32.mxu1 %v7985_v25 }
 0x226   : > { %7327 = vmatmul.mubr.f32.gmra.mrb[38].mxu0 %v8015_v35 }
 0x227   : > { %7027 = vmatmul.mubr.f32.gmra.mrb[38].mxu1 %v8015_v35  ;;  %7329 = vmatprep.mubr.f32.mxu0 %v8087_v63 }
 0x228   : > { %7029 = vmatprep.mubr.f32.mxu1 %v8087_v63 }
 0x22a   : > { %7330 = vmatmul.mubr.f32.gmra.mrb[40].mxu0 %v8094_v2 }
 0x22b   : > { %7030 = vmatmul.mubr.f32.gmra.mrb[40].mxu1 %v8094_v2  ;;  %7332 = vmatprep.mubr.f32.mxu0 %v8103_v6 }
 0x22c   : > { %7032 = vmatprep.mubr.f32.mxu1 %v8103_v6 }
 0x22e   : > { %7333 = vmatmul.mubr.f32.gmra.mrb[42].mxu0 %v8113_v16 }
 0x22f   : > { %7033 = vmatmul.mubr.f32.gmra.mrb[42].mxu1 %v8113_v16  ;;  %7335 = vmatprep.mubr.f32.mxu0 %v8127_v31 }
 0x230   : > { %7035 = vmatprep.mubr.f32.mxu1 %v8127_v31 }
 0x232   : > { %7336 = vmatmul.mubr.f32.gmra.mrb[44].mxu0 %v8139_v44 }
 0x233   : > { %7036 = vmatmul.mubr.f32.gmra.mrb[44].mxu1 %v8139_v44  ;;  %7338 = vmatprep.mubr.f32.mxu0 %v8162_v59 }
 0x234   : > { %7038 = vmatprep.mubr.f32.mxu1 %v8162_v59 }
 0x236   : > { %7339 = vmatmul.mubr.f32.gmra.mrb[46].mxu0 %v8190_v37 }
 0x237   : > { %7039 = vmatmul.mubr.f32.gmra.mrb[46].mxu1 %v8190_v37  ;;  %7341 = vmatprep.mubr.f32.mxu0 %v8201_v42 }
 0x238   : > { %7041 = vmatprep.mubr.f32.mxu1 %v8201_v42 }
 0x23a   : > { %7342 = vmatmul.mubr.f32.gmra.mrb[48].mxu0 %v8227_v18 }
 0x23b   : > { %7042 = vmatmul.mubr.f32.gmra.mrb[48].mxu1 %v8227_v18  ;;  %7344 = vmatprep.mubr.f32.mxu0 %v8232_v38 }
 0x23c   : > { %7044 = vmatprep.mubr.f32.mxu1 %v8232_v38 }
 0x23e   : > { %7345 = vmatmul.mubr.f32.gmra.mrb[50].mxu0 %v8254_v54 }
 0x23f   : > { %7045 = vmatmul.mubr.f32.gmra.mrb[50].mxu1 %v8254_v54  ;;  %7347 = vmatprep.mubr.f32.mxu0 %v8266_v56 }
 0x240   : > { %7047 = vmatprep.mubr.f32.mxu1 %v8266_v56 }
 0x242   : > { %7348 = vmatmul.mubr.f32.gmra.mrb[52].mxu0 %v8277_v48 }
 0x243   : > { %7048 = vmatmul.mubr.f32.gmra.mrb[52].mxu1 %v8277_v48  ;;  %7350 = vmatprep.mubr.f32.mxu0 %v8290_v45 }
 0x244   : > { %7050 = vmatprep.mubr.f32.mxu1 %v8290_v45 }
 0x246   : > { %7351 = vmatmul.mubr.f32.gmra.mrb[54].mxu0 %v8315_v41 }
 0x247   : > { %7051 = vmatmul.mubr.f32.gmra.mrb[54].mxu1 %v8315_v41  ;;  %7353 = vmatprep.mubr.f32.mxu0 %v8329_v52 }
 0x248   : > { %7053 = vmatprep.mubr.f32.mxu1 %v8329_v52 }
 0x24a   : > { %7354 = vmatmul.mubr.f32.gmra.mrb[56].mxu0 %v8366_v40 }
 0x24b   : > { %7054 = vmatmul.mubr.f32.gmra.mrb[56].mxu1 %v8366_v40  ;;  %7356 = vmatprep.mubr.f32.mxu0 %v8373_v29 }
 0x24c   : > { %7056 = vmatprep.mubr.f32.mxu1 %v8373_v29 }
 0x24e   : > { %7357 = vmatmul.mubr.f32.gmra.mrb[58].mxu0 %v8401_v32 }
 0x24f   : > { %7057 = vmatmul.mubr.f32.gmra.mrb[58].mxu1 %v8401_v32  ;;  %7359 = vmatprep.mubr.f32.mxu0 %v8409_v17 }
 0x250   : > { %7059 = vmatprep.mubr.f32.mxu1 %v8409_v17 }
 0x252   : > { %7360 = vmatmul.mubr.f32.gmra.mrb[60].mxu0 %v8433_v0 }
 0x253   : > { %7060 = vmatmul.mubr.f32.gmra.mrb[60].mxu1 %v8433_v0  ;;  %7362 = vmatprep.mubr.f32.mxu0 %v8442_v4 }
 0x254   : > { %7062 = vmatprep.mubr.f32.mxu1 %v8442_v4 }
 0x256   : > { %7363 = vmatmul.mubr.f32.gmra.mrb[62].mxu0 %v8458_v51 }
 0x257   : > { %7063 = vmatmul.mubr.f32.gmra.mrb[62].mxu1 %v8458_v51 }
 0x2ed   : > { %v7319_v9 = vpop.f32.mrb[32].mxu0 }
 0x2ee   : > { %v7019_v10 = vpop.f32.mrb[32].mxu1  ;;  %v5488_v11 = vpop.f32.mrb[33].mxu0 }
 0x2ef   : > { %v3866_v14 = vmax.f32 %v8854_v36, %v7019_v10  ;;  %v3675_v22 = vpop.f32.mrb[33].mxu1 }
 0x2f0   : > { %v3865_v24 = vmax.f32 %v8858_v1, %v3675_v22 }
 0x2f1   : > { %v5679_v25 = vmax.f32 %v3866_v14, %v7319_v9  ;;  %v7322_v35 = vpop.f32.mrb[34].mxu0 }
 0x2f2   : > { %v5678_v42 = vmax.f32 %v3865_v24, %v5488_v11  ;;  %v7022_v48 = vpop.f32.mrb[34].mxu1  ;;  %v5500_v63 = vpop.f32.mrb[35].mxu0 }
 0x2f3   : > { %v5711_v2 = vmax.f32 %v5679_v25, 0.0  ;;  %v3868_v6 = vmax.f32 %v8862_v19, %v7022_v48  ;;  %v3687_v16 = vpop.f32.mrb[35].mxu1 }
 0x2f4   : > { %v5710_v18 = vmax.f32 %v5678_v42, 0.0  ;;  %v3867_v31 = vmax.f32 %v8866_v53, %v3687_v16  ;;  %v9622_v42 = vld [vmem:[#allocation49_spill] sm:$0xff] }
 0x2f5   : > { %5744 = vst.msk [vmem:[%s9163_s13 + $0x8] sm:$0xff] %vm5742_vm1, %v5711_v2  ;;  %v5681_v38 = vmax.f32 %v3868_v6, %v7322_v35  ;;  %v7325_v40 = vpop.f32.mrb[36].mxu0  ;;  %v9623_v2 = vld [vmem:[#allocation52_spill] sm:$0xff] }
 0x2f6   : > { %5743 = vst.msk [vmem:[%s9163_s13] sm:$0xff] %vm5742_vm1, %v5710_v18  ;;  %v5680_v44 = vmax.f32 %v3867_v31, %v5500_v63  ;;  %v7025_v59 = vpop.f32.mrb[36].mxu1  ;;  %v5512_v37 = vpop.f32.mrb[37].mxu0 }
 0x2f7   : > { %v5713_v51 = vmax.f32 %v5681_v38, 0.0  ;;  %v3870_v41 = vmax.f32 %v8870_v43, %v7025_v59  ;;  %v3699_v54 = vpop.f32.mrb[37].mxu1 }
 0x2f8   : > { %v5712_v56 = vmax.f32 %v5680_v44, 0.0  ;;  %v3869_v4 = vmax.f32 %v8874_v49, %v3699_v54 }
 0x2f9   : > { %5746 = vst.msk [vmem:[%s9163_s13 + $0x18] sm:$0xff] %vm5742_vm1, %v5713_v51  ;;  %v5683_v45 = vmax.f32 %v3870_v41, %v7325_v40  ;;  %v7328_v32 = vpop.f32.mrb[38].mxu0  ;;  %v9624_v51 = vld [vmem:[#allocation53_spill] sm:$0xff] }
 0x2fa   : > { %5745 = vst.msk [vmem:[%s9163_s13 + $0x10] sm:$0xff] %vm5742_vm1, %v5712_v56  ;;  %v5682_v29 = vmax.f32 %v3869_v4, %v5512_v37  ;;  %v7028_v52 = vpop.f32.mrb[38].mxu1  ;;  %v5524_v17 = vpop.f32.mrb[39].mxu0 }
 0x2fb   : > { %v5715_v57 = vmax.f32 %v5683_v45, 0.0  ;;  %v3872_v0 = vmax.f32 %v8878_v39, %v7028_v52  ;;  %v3711_v58 = vpop.f32.mrb[39].mxu1 }
 0x2fc   : > { %v5714_v36 = vmax.f32 %v5682_v29, 0.0  ;;  %v3871_v1 = vmax.f32 %v8882_v28, %v3711_v58 }
 0x2fd   : > { %5748 = vst.msk [vmem:[%s9163_s13 + $0x28] sm:$0xff] %vm5742_vm1, %v5715_v57  ;;  %v5685_v19 = vmax.f32 %v3872_v0, %v7328_v32  ;;  %v7331_v53 = vpop.f32.mrb[40].mxu0  ;;  %v9625_v57 = vld [vmem:[#allocation54_spill] sm:$0xff] }
 0x2fe   : > { %5747 = vst.msk [vmem:[%s9163_s13 + $0x20] sm:$0xff] %vm5742_vm1, %v5714_v36  ;;  %v5684_v43 = vmax.f32 %v3871_v1, %v5524_v17  ;;  %v7031_v49 = vpop.f32.mrb[40].mxu1  ;;  %v5536_v7 = vpop.f32.mrb[41].mxu0 }
 0x2ff   : > { %v5717_v55 = vmax.f32 %v5685_v19, 0.0  ;;  %v3874_v47 = vmax.f32 %v8886_v26, %v7031_v49  ;;  %v3723_v39 = vpop.f32.mrb[41].mxu1  ;;  %v9626_v49 = vld [vmem:[#allocation61_spill] sm:$0xff] }
 0x300   : > { %v5716_v3 = vmax.f32 %v5684_v43, 0.0  ;;  %v3873_v8 = vmax.f32 %v8890_v61, %v3723_v39 }
 0x301   : > { %5750 = vst.msk [vmem:[%s9163_s13 + $0x38] sm:$0xff] %vm5742_vm1, %v5717_v55  ;;  %v5687_v28 = vmax.f32 %v3874_v47, %v7331_v53  ;;  %v7334_v33 = vpop.f32.mrb[42].mxu0  ;;  %v9627_v47 = vld [vmem:[#allocation63_spill] sm:$0xff] }
 0x302   : > { %5749 = vst.msk [vmem:[%s9163_s13 + $0x30] sm:$0xff] %vm5742_vm1, %v5716_v3  ;;  %v5686_v12 = vmax.f32 %v3873_v8, %v5536_v7  ;;  %v7034_v5 = vpop.f32.mrb[42].mxu1  ;;  %v5548_v34 = vpop.f32.mrb[43].mxu0 }
 0x303   : > { %v5719_v50 = vmax.f32 %v5687_v28, 0.0  ;;  %v3876_v9 = vmax.f32 %v8894_v20, %v7034_v5  ;;  %v3735_v26 = vpop.f32.mrb[43].mxu1 }
 0x304   : > { %v5718_v10 = vmax.f32 %v5686_v12, 0.0  ;;  %v3875_v11 = vmax.f32 %v8898_v23, %v3735_v26 }
 0x305   : > { %5752 = vst.msk [vmem:[%s9163_s13 + $0x48] sm:$0xff] %vm5742_vm1, %v5719_v50  ;;  %v5689_v61 = vmax.f32 %v3876_v9, %v7334_v33  ;;  %v7337_v14 = vpop.f32.mrb[44].mxu0 }
 0x306   : > { %5751 = vst.msk [vmem:[%s9163_s13 + $0x40] sm:$0xff] %vm5742_vm1, %v5718_v10  ;;  %v5688_v22 = vmax.f32 %v3875_v11, %v5548_v34  ;;  %v7037_v24 = vpop.f32.mrb[44].mxu1  ;;  %v5560_v25 = vpop.f32.mrb[45].mxu0 }
 0x307   : > { %v5721_v35 = vmax.f32 %v5689_v61, 0.0  ;;  %v3878_v48 = vmax.f32 %v9622_v42, %v7037_v24  ;;  %v3747_v20 = vpop.f32.mrb[45].mxu1 }
 0x308   : > { %v5720_v63 = vmax.f32 %v5688_v22, 0.0  ;;  %v3877_v6 = vmax.f32 %v9623_v2, %v3747_v20 }
 0x309   : > { %5754 = vst.msk [vmem:[%s9163_s13 + $0x58] sm:$0xff] %vm5742_vm1, %v5721_v35  ;;  %v5691_v23 = vmax.f32 %v3878_v48, %v7337_v14  ;;  %v7340_v16 = vpop.f32.mrb[46].mxu0  ;;  %v9629_v48 = vld [vmem:[#allocation13_spill] sm:$0xff] }
 0x30a   : > { %5753 = vst.msk [vmem:[%s9163_s13 + $0x50] sm:$0xff] %vm5742_vm1, %v5720_v63  ;;  %v5690_v18 = vmax.f32 %v3877_v6, %v5560_v25  ;;  %v7040_v31 = vpop.f32.mrb[46].mxu1  ;;  %v5572_v38 = vpop.f32.mrb[47].mxu0  ;;  %v9628_v25 = vld [vmem:[#allocation12_spill] sm:$0xff] }
 0x30b   : > { %v5723_v40 = vmax.f32 %v5691_v23, 0.0  ;;  %v3880_v44 = vmax.f32 %v8910_v30, %v7040_v31  ;;  %v3759_v59 = vpop.f32.mrb[47].mxu1 }
 0x30c   : > { %v5722_v37 = vmax.f32 %v5690_v18, 0.0  ;;  %v3879_v41 = vmax.f32 %v9624_v51, %v3759_v59  ;;  %v9630_v18 = vld [vmem:[#allocation14_spill] sm:$0xff] }
 0x30d   : > { %5756 = vst.msk [vmem:[%s9163_s13 + $0x68] sm:$0xff] %vm5742_vm1, %v5723_v40  ;;  %v5693_v54 = vmax.f32 %v3880_v44, %v7340_v16  ;;  %v7343_v56 = vpop.f32.mrb[48].mxu0  ;;  %v9631_v44 = vld [vmem:[#allocation15_spill] sm:$0xff] }
 0x30e   : > { %5755 = vst.msk [vmem:[%s9163_s13 + $0x60] sm:$0xff] %vm5742_vm1, %v5722_v37  ;;  %v5692_v4 = vmax.f32 %v3879_v41, %v5572_v38  ;;  %v7043_v45 = vpop.f32.mrb[48].mxu1  ;;  %v5584_v32 = vpop.f32.mrb[49].mxu0 }
 0x30f   : > { %v5725_v29 = vmax.f32 %v5693_v54, 0.0  ;;  %v3882_v52 = vmax.f32 %v8918_v46, %v7043_v45  ;;  %v3771_v30 = vpop.f32.mrb[49].mxu1  ;;  %v9632_v45 = vld [vmem:[#allocation17_spill] sm:$0xff] }
 0x310   : > { %v5724_v17 = vmax.f32 %v5692_v4, 0.0  ;;  %v3881_v0 = vmax.f32 %v9625_v57, %v3771_v30  ;;  %v9633_v30 = vld [vmem:[#allocation18_spill] sm:$0xff] }
 0x311   : > { %5758 = vst.msk [vmem:[%s9163_s13 + $0x78] sm:$0xff] %vm5742_vm1, %v5725_v29  ;;  %v5695_v58 = vmax.f32 %v3882_v52, %v7343_v56  ;;  %v7346_v36 = vpop.f32.mrb[50].mxu0 }
 0x312   : > { %5757 = vst.msk [vmem:[%s9163_s13 + $0x70] sm:$0xff] %vm5742_vm1, %v5724_v17  ;;  %v5694_v1 = vmax.f32 %v3881_v0, %v5584_v32  ;;  %v7046_v19 = vpop.f32.mrb[50].mxu1  ;;  %v5596_v53 = vpop.f32.mrb[51].mxu0 }
 0x313   : > { %v5727_v43 = vmax.f32 %v5695_v58, 0.0  ;;  %v3884_v7 = vmax.f32 %v9626_v49, %v7046_v19  ;;  %v3783_v46 = vpop.f32.mrb[51].mxu1 }
 0x314   : > { %v5726_v55 = vmax.f32 %v5694_v1, 0.0  ;;  %v3883_v39 = vmax.f32 %v9627_v47, %v3783_v46 }
 0x315   : > { %5760 = vst.msk [vmem:[%s9163_s13 + $0x88] sm:$0xff] %vm5742_vm1, %v5727_v43  ;;  %v5697_v3 = vmax.f32 %v3884_v7, %v7346_v36  ;;  %v7349_v8 = vpop.f32.mrb[52].mxu0 }
 0x316   : > { %5759 = vst.msk [vmem:[%s9163_s13 + $0x80] sm:$0xff] %vm5742_vm1, %v5726_v55  ;;  %v5696_v28 = vmax.f32 %v3883_v39, %v5596_v53  ;;  %v7049_v33 = vpop.f32.mrb[52].mxu1  ;;  %v5608_v12 = vpop.f32.mrb[53].mxu0 }
 0x317   : > { %v5729_v5 = vmax.f32 %v5697_v3, 0.0  ;;  %v3886_v34 = vmax.f32 %v8934_v13, %v7049_v33  ;;  %v3795_v50 = vpop.f32.mrb[53].mxu1 }
 0x318   : > { %v5728_v9 = vmax.f32 %v5696_v28, 0.0  ;;  %v3885_v26 = vmax.f32 %v8938_v62, %v3795_v50 }
 0x319   : > { %5762 = vst.msk [vmem:[%s9163_s13 + $0x98] sm:$0xff] %vm5742_vm1, %v5729_v5  ;;  %v5699_v10 = vmax.f32 %v3886_v34, %v7349_v8  ;;  %v7352_v11 = vpop.f32.mrb[54].mxu0 }
 0x31a   : > { %5761 = vst.msk [vmem:[%s9163_s13 + $0x90] sm:$0xff] %vm5742_vm1, %v5728_v9  ;;  %v5698_v61 = vmax.f32 %v3885_v26, %v5608_v12  ;;  %v7052_v14 = vpop.f32.mrb[54].mxu1  ;;  %v5620_v22 = vpop.f32.mrb[55].mxu0 }
 0x31b   : > { %v5731_v24 = vmax.f32 %v5699_v10, 0.0  ;;  %v3888_v35 = vmax.f32 %v9628_v25, %v7052_v14  ;;  %v3807_v13 = vpop.f32.mrb[55].mxu1 }
 0x31c   : > { %v5730_v42 = vmax.f32 %v5698_v61, 0.0  ;;  %v3887_v20 = vmax.f32 %v9629_v48, %v3807_v13 }
 0x31d   : > { %5764 = vst.msk [vmem:[%s9163_s13 + $0xa8] sm:$0xff] %vm5742_vm1, %v5731_v24  ;;  %v5701_v62 = vmax.f32 %v3888_v35, %v7352_v11  ;;  %v7355_v63 = vpop.f32.mrb[56].mxu0 }
 0x31e   : > { %5763 = vst.msk [vmem:[%s9163_s13 + $0xa0] sm:$0xff] %vm5742_vm1, %v5730_v42  ;;  %v5700_v2 = vmax.f32 %v3887_v20, %v5620_v22  ;;  %v7055_v6 = vpop.f32.mrb[56].mxu1  ;;  %v5632_v23 = vpop.f32.mrb[57].mxu0 }
 0x31f   : > { %v5733_v16 = vmax.f32 %v5701_v62, 0.0  ;;  %v3890_v31 = vmax.f32 %v9630_v18, %v7055_v6  ;;  %v3819_v38 = vpop.f32.mrb[57].mxu1 }
 0x320   : > { %v5732_v40 = vmax.f32 %v5700_v2, 0.0  ;;  %v3889_v59 = vmax.f32 %v9631_v44, %v3819_v38 }
 0x321   : > { %5766 = vst.msk [vmem:[%s9163_s13 + $0xb8] sm:$0xff] %vm5742_vm1, %v5733_v16  ;;  %v5703_v37 = vmax.f32 %v3890_v31, %v7355_v63  ;;  %v7358_v51 = vpop.f32.mrb[58].mxu0 }
 0x322   : > { %5765 = vst.msk [vmem:[%s9163_s13 + $0xb0] sm:$0xff] %vm5742_vm1, %v5732_v40  ;;  %v5702_v41 = vmax.f32 %v3889_v59, %v5632_v23  ;;  %v7058_v54 = vpop.f32.mrb[58].mxu1  ;;  %v5644_v56 = vpop.f32.mrb[59].mxu0 }
 0x323   : > { %v5735_v4 = vmax.f32 %v5703_v37, 0.0  ;;  %v3892_v32 = vmax.f32 %v9632_v45, %v7058_v54  ;;  %v3831_v29 = vpop.f32.mrb[59].mxu1 }
 0x324   : > { %v5734_v52 = vmax.f32 %v5702_v41, 0.0  ;;  %v3891_v17 = vmax.f32 %v9633_v30, %v3831_v29 }
 0x325   : > { %5768 = vst.msk [vmem:[%s9163_s13 + $0xc8] sm:$0xff] %vm5742_vm1, %v5735_v4  ;;  %v5705_v57 = vmax.f32 %v3892_v32, %v7358_v51  ;;  %v7361_v0 = vpop.f32.mrb[60].mxu0 }
 0x326   : > { %5767 = vst.msk [vmem:[%s9163_s13 + $0xc0] sm:$0xff] %vm5742_vm1, %v5734_v52  ;;  %v5704_v58 = vmax.f32 %v3891_v17, %v5644_v56  ;;  %v7061_v36 = vpop.f32.mrb[60].mxu1  ;;  %v5656_v1 = vpop.f32.mrb[61].mxu0 }
 0x327   : > { %v5737_v19 = vmax.f32 %v5705_v57, 0.0  ;;  %v3894_v53 = vmax.f32 %v8970_v21, %v7061_v36  ;;  %v3843_v43 = vpop.f32.mrb[61].mxu1 }
 0x328   : > { %v5736_v49 = vmax.f32 %v5704_v58, 0.0  ;;  %v3893_v7 = vmax.f32 %v8974_v27, %v3843_v43 }
 0x329   : > { %5770 = vst.msk [vmem:[%s9163_s13 + $0xd8] sm:$0xff] %vm5742_vm1, %v5737_v19  ;;  %v5707_v46 = vmax.f32 %v3894_v53, %v7361_v0  ;;  %v7364_v55 = vpop.f32.mrb[62].mxu0 }
 0x32a   : > { %5769 = vst.msk [vmem:[%s9163_s13 + $0xd0] sm:$0xff] %vm5742_vm1, %v5736_v49  ;;  %v5706_v47 = vmax.f32 %v3893_v7, %v5656_v1  ;;  %v7064_v39 = vpop.f32.mrb[62].mxu1  ;;  %v5668_v3 = vpop.f32.mrb[63].mxu0 }
 0x32b   : > { %v5739_v8 = vmax.f32 %v5707_v46, 0.0  ;;  %v3896_v21 = vmax.f32 %v8978_v15, %v7064_v39  ;;  %v3855_v28 = vpop.f32.mrb[63].mxu1 }
 0x32c   : > { %v5738_v33 = vmax.f32 %v5706_v47, 0.0  ;;  %v3895_v12 = vmax.f32 %v8982_v60, %v3855_v28 }
 0x32d   : > { %5772 = vst.msk [vmem:[%s9163_s13 + $0xe8] sm:$0xff] %vm5742_vm1, %v5739_v8  ;;  %v5709_v27 = vmax.f32 %v3896_v21, %v7364_v55 }
 0x32e   : > { %5771 = vst.msk [vmem:[%s9163_s13 + $0xe0] sm:$0xff] %vm5742_vm1, %v5738_v33  ;;  %v5708_v5 = vmax.f32 %v3895_v12, %v5668_v3 }
 0x32f   : > { %v5741_v34 = vmax.f32 %v5709_v27, 0.0 }
 0x330   : > { %v5740_v50 = vmax.f32 %v5708_v5, 0.0 }
 0x331   : > { %5774 = vst.msk [vmem:[%s9163_s13 + $0xf8] sm:$0xff] %vm5742_vm1, %v5741_v34 }
 0x332   : > { %5773 = vst.msk [vmem:[%s9163_s13 + $0xf0] sm:$0xff] %vm5742_vm1, %v5740_v50 }
 0x333 PF: > { %s12_s11 = sadd.s32 1, %s7892_s11   ;;  %s9634_s9 = smov %s7888_s10 }
 0x334   : > { %p9_p5 = scmp.ge.s32.totalorder %s12_s11, 4   ;;  %s9635_s10 = smov %s9637_s12 }
 0x336   :  { %11 = sbr.rel (!%p9_p5) target bundleno = 2 (0x2), region = 60 }

</bundles_post_ra>
